<compile_context>
chip_gen: v7x
topology: tpu7x:2x2x1
jax: 0.10.0
libtpu: 0.0.40
codegen_flags: <defaults>
</compile_context>

<pallas_src>
import jax
import jax.numpy as jnp
from jax.experimental import pallas as pl
from jax.experimental.pallas import tpu as pltpu


# ----------------------------- Pallas kernel --------------------------------
def gsage_kernel(a_ref, x_hbm, w_ref, b_ref, invdeg_ref, pa_ref, p_ref,
                 invcnt_ref, w3_ref, b3_ref, o_ref,
                 xbuf, h1, acc, agg3, root3, dma_sem):
    l = pl.program_id(0)          # aggregation layer (0 or 1)
    i = pl.program_id(1)          # node-row tile of A
    k = pl.program_id(2)          # reduction (column) tile of A
    ni = pl.num_programs(1)
    nk = pl.num_programs(2)
    tm, tk = a_ref.shape
    Fp = xbuf.shape[1]

    # ---- one-time init: DMA node features HBM -> VMEM, zero head accums ----
    @pl.when(jnp.logical_and(l == 0, jnp.logical_and(i == 0, k == 0)))
    def _():
        cp = pltpu.make_async_copy(x_hbm, xbuf, dma_sem)
        cp.start()
        cp.wait()
        agg3[...] = jnp.zeros_like(agg3)
        root3[...] = jnp.zeros_like(root3)

    # ---- accumulate unnormalized neighbor sum: acc += A01[i,k] @ src[k] ----
    @pl.when(k == 0)
    def _():
        acc[...] = jnp.zeros_like(acc)

    koff = pl.multiple_of(k * tk, tk)

    @pl.when(l == 0)
    def _():
        acc[...] += jnp.dot(a_ref[...], xbuf[pl.ds(koff, tk), :],
                            preferred_element_type=jnp.float32)

    @pl.when(l == 1)
    def _():
        acc[...] += jnp.dot(a_ref[...], h1[pl.ds(koff, tk), :],
                            preferred_element_type=jnp.float32)

    # ---- reduction done: exact mean scale + fused SAGE linear ---------------
    @pl.when(k == nk - 1)
    def _():
        roff = pl.multiple_of(i * tm, tm)
        neigh = (acc[...] * invdeg_ref[...]).astype(jnp.bfloat16)
        wl = w_ref[0, :Fp, :]
        wr = w_ref[0, Fp:, :]
        bias = b_ref[0]

        @pl.when(l == 0)
        def _():
            root = xbuf[pl.ds(roff, tm), :]
            h = (jnp.dot(neigh, wl, preferred_element_type=jnp.float32)
                 + jnp.dot(root, wr, preferred_element_type=jnp.float32)
                 + bias)
            # TODO(synk): F.dropout(training=True) not modelled; eval identity.
            h1[pl.ds(roff, tm), :] = jnp.maximum(h, 0.0).astype(jnp.bfloat16)

        @pl.when(l == 1)
        def _():
            root = h1[pl.ds(roff, tm), :]
            h = (jnp.dot(neigh, wl, preferred_element_type=jnp.float32)
                 + jnp.dot(root, wr, preferred_element_type=jnp.float32)
                 + bias)
            h2 = jnp.maximum(h, 0.0).astype(jnp.bfloat16)
            # streamed head: fold layer-3 aggregation + global_mean_pool
            agg3[...] += jnp.dot(pa_ref[...], h2,
                                 preferred_element_type=jnp.float32)
            root3[...] += jnp.dot(p_ref[...], h2,
                                  preferred_element_type=jnp.float32)

    # ---- final grid step: tiny classifier head on G pooled rows -------------
    @pl.when(jnp.logical_and(l == pl.num_programs(0) - 1,
                             jnp.logical_and(i == ni - 1, k == nk - 1)))
    def _():
        a3 = (agg3[...] * invcnt_ref[...]).astype(jnp.bfloat16)
        r3 = (root3[...] * invcnt_ref[...]).astype(jnp.bfloat16)
        o_ref[...] = (jnp.dot(a3, w3_ref[:Fp, :],
                              preferred_element_type=jnp.float32)
                      + jnp.dot(r3, w3_ref[Fp:, :],
                                preferred_element_type=jnp.float32)
                      + b3_ref[...])


# ------------------------------ wrapper --------------------------------------
def _round_up(x, m):
    return (x + m - 1) // m * m


def _pick_tile(total, cap):
    """Largest multiple of 128 that divides `total` and is <= cap."""
    cap = max(128, (min(cap, total) // 128) * 128)
    t = cap
    while total % t:
        t -= 128
    return t


def _pad2(m, rows, cols):
    out = jnp.zeros((rows, cols), m.dtype)
    return out.at[:m.shape[0], :m.shape[1]].set(m)


def gsage_forward(a, p, x, params, *, tile_m=512, tile_k=2048):
    """Fused GraphSAGE forward.

    a: (N, N) f32 mean-aggregation matrix, p: (G, N) f32 mean-pool matrix,
    x: (N, Cin) f32 node features, params: 3 x (W_l, W_r, b).
    """
    (w1l, w1r, b1), (w2l, w2r, b2), (w3l, w3r, b3) = params
    N = a.shape[0]
    G = p.shape[0]
    cin, hid, cout = x.shape[1], w1l.shape[1], w3l.shape[1]

    # lane-dense padded sizes (pad N only to 128, not to the tile size)
    Fp = max(_round_up(cin, 128), _round_up(hid, 128))
    Cp = _round_up(cout, 128)
    Np = _round_up(N, 128)
    Gp = _round_up(G, 8)
    tm = _pick_tile(Np, tile_m)
    tk = _pick_tile(Np, tile_k)

    # exact 0/1 adjacency (bf16-exact) + f32 per-row 1/deg post-scale
    a01 = (a > 0).astype(jnp.float32)
    deg = a01.sum(axis=1, keepdims=True)
    invdeg = 1.0 / jnp.maximum(deg, 1.0)
    p01 = (p > 0).astype(jnp.float32)
    cnt = p01.sum(axis=1, keepdims=True)
    invcnt = 1.0 / jnp.maximum(cnt, 1.0)

    a01_p = _pad2(a01, Np, Np).astype(jnp.bfloat16)
    invdeg_p = _pad2(invdeg, Np, 1)                              # f32
    x_p = _pad2(x, Np, Fp).astype(jnp.bfloat16)
    p01_p = _pad2(p01, Gp, Np).astype(jnp.bfloat16)
    pa_p = _pad2(p01 @ a, Gp, Np).astype(jnp.bfloat16)           # P01 @ A_norm
    invcnt_p = _pad2(invcnt, Gp, 1)                              # f32
    # NOTE: folded head adds b3 unconditionally; differs from the reference
    # only for empty graphs (pooled row would be 0 there).

    # stacked per-layer [W_l ; W_r] weights, zero-padded to lane multiples
    w_stack = jnp.stack([
        jnp.concatenate([_pad2(w1l, Fp, Fp), _pad2(w1r, Fp, Fp)], axis=0),
        jnp.concatenate([_pad2(w2l, Fp, Fp), _pad2(w2r, Fp, Fp)], axis=0),
    ]).astype(jnp.bfloat16)                                      # (2, 2Fp, Fp)
    b_stack = jnp.stack([_pad2(b1, 1, Fp), _pad2(b2, 1, Fp)])    # (2, 1, Fp) f32
    w3_f = jnp.concatenate([_pad2(w3l, Fp, Cp), _pad2(w3r, Fp, Cp)],
                           axis=0).astype(jnp.bfloat16)          # (2Fp, Cp)
    b3_f = _pad2(b3, 1, Cp)                                      # (1, Cp) f32

    grid = (2, Np // tm, Np // tk)

    # explicit VMEM budget (double-buffered input blocks + scratch)
    vmem_est = (
        2 * tm * tk * 2                    # A tile (double buffered)
        + 2 * (2 * Fp) * Fp * 2            # W1/W2 block
        + 2 * Fp * 4                       # b1/b2 block
        + 2 * tm * 128 * 4                 # 1/deg block (lane padded)
        + 2 * 2 * Gp * tm * 2              # P@A + P streamed blocks
        + 2 * Gp * 128 * 4                 # 1/|g| block (lane padded)
        + 2 * (2 * Fp) * Cp * 2            # W3 block
        + 2 * Cp * 4                       # b3 block
        + 2 * Gp * Cp * 4                  # output block
        + 2 * Np * Fp * 2                  # xbuf + h1 scratch
        + tm * Fp * 4                      # acc scratch
        + 2 * Gp * Fp * 4                  # agg3 + root3 scratch
    )
    vmem_limit = int(min(64 << 20, max(32 << 20, 2 * vmem_est)))

    cost = pl.CostEstimate(
        flops=int(2 * 2 * Np * Np * Fp          # two A @ h aggregation passes
                  + 2 * 2 * Np * (2 * Fp) * Fp  # two fused SAGE linears
                  + 2 * 2 * Gp * Np * Fp        # streamed PA@h2 and P@h2
                  + 2 * Gp * (2 * Fp) * Cp),    # head linear
        transcendentals=0,
        bytes_accessed=int(2 * a01_p.size * 2 + x_p.size * 2 + w_stack.size * 2
                           + 2 * (pa_p.size + p01_p.size) * 2 + w3_f.size * 2
                           + (b_stack.size + b3_f.size + invdeg_p.size
                              + invcnt_p.size + Gp * Cp) * 4))

    out = pl.pallas_call(
        gsage_kernel,
        out_shape=jax.ShapeDtypeStruct((Gp, Cp), jnp.float32),
        grid_spec=pltpu.PrefetchScalarGridSpec(
            num_scalar_prefetch=0,
            grid=grid,
            in_specs=[
                pl.BlockSpec((tm, tk), lambda l, i, k: (i, k)),           # A01
                pl.BlockSpec(memory_space=pl.ANY),                        # x HBM
                pl.BlockSpec((1, 2 * Fp, Fp), lambda l, i, k: (l, 0, 0)), # W1/W2
                pl.BlockSpec((1, 1, Fp), lambda l, i, k: (l, 0, 0)),      # b1/b2
                pl.BlockSpec((tm, 1), lambda l, i, k: (i, 0)),            # 1/deg
                pl.BlockSpec((Gp, tm), lambda l, i, k: (0, i)),           # P01@A
                pl.BlockSpec((Gp, tm), lambda l, i, k: (0, i)),           # P01
                pl.BlockSpec((Gp, 1), lambda l, i, k: (0, 0)),            # 1/|g|
                pl.BlockSpec((2 * Fp, Cp), lambda l, i, k: (0, 0)),       # W3
                pl.BlockSpec((1, Cp), lambda l, i, k: (0, 0)),            # b3
            ],
            out_specs=pl.BlockSpec((Gp, Cp), lambda l, i, k: (0, 0)),
            scratch_shapes=[
                pltpu.VMEM((Np, Fp), jnp.bfloat16),   # xbuf (node features)
                pltpu.VMEM((Np, Fp), jnp.bfloat16),   # h1 (layer-1 output)
                pltpu.VMEM((tm, Fp), jnp.float32),    # aggregation accumulator
                pltpu.VMEM((Gp, Fp), jnp.float32),    # pooled agg accumulator
                pltpu.VMEM((Gp, Fp), jnp.float32),    # pooled root accumulator
                pltpu.SemaphoreType.DMA,              # x HBM->VMEM copy
            ]),
        compiler_params=pltpu.CompilerParams(
            # cross-step deps through VMEM scratch -> no "parallel" axes
            dimension_semantics=("arbitrary", "arbitrary", "arbitrary"),
            vmem_limit_bytes=vmem_limit),
        cost_estimate=cost,
    )(a01_p, x_p, w_stack, b_stack, invdeg_p, pa_p, p01_p, invcnt_p, w3_f, b3_f)

    return out[:G, :cout]


# ------------------------------ JAX glue -------------------------------------
def build_mean_agg_matrix(edge_index, num_nodes):
    # A[i, j] = 1/deg_in(i) if edge (j -> i) exists (mean over incoming msgs).
    src, dst = edge_index[0], edge_index[1]
    a = jnp.zeros((num_nodes, num_nodes), jnp.float32).at[dst, src].add(1.0)
    deg = a.sum(axis=1, keepdims=True)
    return a / jnp.maximum(deg, 1.0)


def build_mean_pool_matrix(batch, num_graphs, num_nodes):
    # P[g, i] = 1/|graph g| if batch[i] == g
    p = (jnp.arange(num_graphs)[:, None] == batch[None, :]).astype(jnp.float32)
    cnt = p.sum(axis=1, keepdims=True)
    return p / jnp.maximum(cnt, 1.0)


def init_params(key, cin, hidden, cout):
    def lin(k, fin, fout):
        scale = 1.0 / jnp.sqrt(fin)
        return jax.random.uniform(k, (fin, fout), jnp.float32, -scale, scale)

    ks = jax.random.split(key, 9)
    p1 = (lin(ks[0], cin, hidden), lin(ks[1], cin, hidden),
          jax.random.uniform(ks[2], (1, hidden), jnp.float32, -0.1, 0.1))
    p2 = (lin(ks[3], hidden, hidden), lin(ks[4], hidden, hidden),
          jax.random.uniform(ks[5], (1, hidden), jnp.float32, -0.1, 0.1))
    p3 = (lin(ks[6], hidden, cout), lin(ks[7], hidden, cout),
          jax.random.uniform(ks[8], (1, cout), jnp.float32, -0.1, 0.1))
    return (p1, p2, p3)


def reference_forward(a, p, x, params):
    (w1l, w1r, b1), (w2l, w2r, b2), (w3l, w3r, b3) = params
    h = jnp.maximum(a @ x @ w1l + x @ w1r + b1, 0.0)
    h = jnp.maximum(a @ h @ w2l + h @ w2r + b2, 0.0)
    h = a @ h @ w3l + h @ w3r + b3
    return p @ h


if __name__ == "__main__":
    key = jax.random.PRNGKey(0)
    k_x, k_p = jax.random.split(key)

    # Small synthetic graph batch: 2 graphs, 8 nodes each.
    N, CIN, HID, COUT, G = 16, 8, 32, 8, 2

    x = jax.random.normal(k_x, (N, CIN), jnp.float32)

    # Deterministic edges: ring within each graph + one chord, both directions.
    src_list, dst_list = [], []
    for g in range(G):
        base = g * 8
        for i in range(8):
            u, v = base + i, base + (i + 1) % 8
            src_list += [u, v]
            dst_list += [v, u]
        src_list += [base + 0, base + 4]
        dst_list += [base + 4, base + 0]
    edge_index = jnp.array([src_list, dst_list], dtype=jnp.int32)
    batch = jnp.array([0] * 8 + [1] * 8, dtype=jnp.int32)

    a = build_mean_agg_matrix(edge_index, N)
    p = build_mean_pool_matrix(batch, G, N)
    params = init_params(k_p, CIN, HID, COUT)

    out = gsage_forward(a, p, x, params)
    out = jax.block_until_ready(out)

    ref = reference_forward(a, p, x, params)
    assert out.shape == (G, COUT)
    # bf16 MXU inputs (activations, weights, P/P@A) with f32 accumulation and
    # exact f32 mean normalization -> modest tolerance vs. the f32 reference.
    assert jnp.allclose(out, ref, atol=5e-2, rtol=5e-2), "mismatch vs JAX ref"

    print("KERNEL_OK")
</pallas_src>

<mosaic_0001>
module attributes {stable_mosaic.version = 11 : i64} {
  func.func @gsage_kernel(%arg0: i32, %arg1: i32, %arg2: i32, %arg3: memref<128x128xbf16, #tpu.memory_space<vmem>>, %arg4: memref<128x128xbf16, #tpu.memory_space<any>>, %arg5: memref<1x256x128xbf16, #tpu.memory_space<vmem>>, %arg6: memref<1x1x128xf32, #tpu.memory_space<vmem>>, %arg7: memref<128x1xf32, #tpu.memory_space<vmem>>, %arg8: memref<8x128xbf16, #tpu.memory_space<vmem>>, %arg9: memref<8x128xbf16, #tpu.memory_space<vmem>>, %arg10: memref<8x1xf32, #tpu.memory_space<vmem>>, %arg11: memref<256x128xbf16, #tpu.memory_space<vmem>>, %arg12: memref<1x128xf32, #tpu.memory_space<vmem>>, %arg13: memref<8x128xf32, #tpu.memory_space<vmem>>, %arg14: memref<128x128xbf16, #tpu.memory_space<vmem>>, %arg15: memref<128x128xbf16, #tpu.memory_space<vmem>>, %arg16: memref<128x128xf32, #tpu.memory_space<vmem>>, %arg17: memref<8x128xf32, #tpu.memory_space<vmem>>, %arg18: memref<8x128xf32, #tpu.memory_space<vmem>>, %arg19: memref<!tpu.dma_semaphore, #tpu.memory_space<semaphore_mem>>) attributes {dimension_semantics = [#tpu.dimension_semantics<arbitrary>, #tpu.dimension_semantics<arbitrary>, #tpu.dimension_semantics<arbitrary>], iteration_bounds = array<i64: 2, 1, 1>, scalar_prefetch = 0 : i64, scratch_operands = 6 : i64, tpu.core_type = #tpu.core_type<tc>, window_params = [{transform_indices = @transform_0, window_bounds = array<i64: 128, 128>}, {}, {transform_indices = @transform_2, window_bounds = array<i64: 1, 256, 128>}, {transform_indices = @transform_3, window_bounds = array<i64: 1, 1, 128>}, {transform_indices = @transform_4, window_bounds = array<i64: 128, 1>}, {transform_indices = @transform_5, window_bounds = array<i64: 8, 128>}, {transform_indices = @transform_6, window_bounds = array<i64: 8, 128>}, {pipeline_mode = #tpu.pipeline_mode<synchronous>, transform_indices = @transform_7, window_bounds = array<i64: 8, 1>}, {pipeline_mode = #tpu.pipeline_mode<synchronous>, transform_indices = @transform_8, window_bounds = array<i64: 256, 128>}, {pipeline_mode = #tpu.pipeline_mode<synchronous>, transform_indices = @transform_9, window_bounds = array<i64: 1, 128>}, {pipeline_mode = #tpu.pipeline_mode<synchronous>, transform_indices = @transform_10, window_bounds = array<i64: 8, 128>}]} {
    %c0_i32 = arith.constant 0 : i32
    %0 = arith.cmpi eq, %arg0, %c0_i32 : i32
    %c0_i32_0 = arith.constant 0 : i32
    %1 = arith.cmpi eq, %arg1, %c0_i32_0 : i32
    %c0_i32_1 = arith.constant 0 : i32
    %2 = arith.cmpi eq, %arg2, %c0_i32_1 : i32
    %3 = arith.andi %1, %2 : i1
    %4 = arith.andi %0, %3 : i1
    %5 = arith.extui %4 : i1 to i32
    %c0_i32_2 = arith.constant 0 : i32
    %6 = arith.cmpi ne, %5, %c0_i32_2 : i32
    scf.if %6 {
      tpu.enqueue_dma source(%arg4 : memref<128x128xbf16, #tpu.memory_space<any>>) target(%arg14 : memref<128x128xbf16, #tpu.memory_space<vmem>>) target_semaphore(%arg19 : memref<!tpu.dma_semaphore, #tpu.memory_space<semaphore_mem>>)
      tpu.wait_dma2 semaphore(%arg19 : memref<!tpu.dma_semaphore, #tpu.memory_space<semaphore_mem>>) src(%arg4 : memref<128x128xbf16, #tpu.memory_space<any>>) dst(%arg14 : memref<128x128xbf16, #tpu.memory_space<vmem>>)
      %cst = arith.constant 0.000000e+00 : f32
      %28 = vector.broadcast %cst : f32 to vector<8x128xf32>
      %c0 = arith.constant 0 : index
      %c0_14 = arith.constant 0 : index
      %29 = vector.load %arg17[%c0, %c0_14] : memref<8x128xf32, #tpu.memory_space<vmem>>, vector<8x128xf32>
      tpu.vector_store %arg17[%c0, %c0_14], %28 {strides = array<i32>} : memref<8x128xf32, #tpu.memory_space<vmem>>, vector<8x128xf32>,
      %cst_15 = arith.constant 0.000000e+00 : f32
      %30 = vector.broadcast %cst_15 : f32 to vector<8x128xf32>
      %c0_16 = arith.constant 0 : index
      %c0_17 = arith.constant 0 : index
      %31 = vector.load %arg18[%c0_16, %c0_17] : memref<8x128xf32, #tpu.memory_space<vmem>>, vector<8x128xf32>
      tpu.vector_store %arg18[%c0_16, %c0_17], %30 {strides = array<i32>} : memref<8x128xf32, #tpu.memory_space<vmem>>, vector<8x128xf32>,
    } else {
    }
    %c0_i32_3 = arith.constant 0 : i32
    %7 = arith.cmpi eq, %arg2, %c0_i32_3 : i32
    %8 = arith.extui %7 : i1 to i32
    %c0_i32_4 = arith.constant 0 : i32
    %9 = arith.cmpi ne, %8, %c0_i32_4 : i32
    scf.if %9 {
      %cst = arith.constant 0.000000e+00 : f32
      %28 = vector.broadcast %cst : f32 to vector<128x128xf32>
      %c0 = arith.constant 0 : index
      %c0_14 = arith.constant 0 : index
      %29 = vector.load %arg16[%c0, %c0_14] : memref<128x128xf32, #tpu.memory_space<vmem>>, vector<128x128xf32>
      tpu.vector_store %arg16[%c0, %c0_14], %28 {strides = array<i32>} : memref<128x128xf32, #tpu.memory_space<vmem>>, vector<128x128xf32>,
    } else {
    }
    %c128_i32 = arith.constant 128 : i32
    %10 = arith.muli %arg2, %c128_i32 : i32
    %11 = tpu.assume_multiple %10, 128 : i32
    %c0_i32_5 = arith.constant 0 : i32
    %12 = arith.cmpi eq, %arg0, %c0_i32_5 : i32
    %13 = arith.extui %12 : i1 to i32
    %c0_i32_6 = arith.constant 0 : i32
    %14 = arith.cmpi ne, %13, %c0_i32_6 : i32
    scf.if %14 {
      %c0 = arith.constant 0 : index
      %c0_14 = arith.constant 0 : index
      %28 = vector.load %arg16[%c0, %c0_14] : memref<128x128xf32, #tpu.memory_space<vmem>>, vector<128x128xf32>
      %c0_15 = arith.constant 0 : index
      %c0_16 = arith.constant 0 : index
      %29 = vector.load %arg3[%c0_15, %c0_16] : memref<128x128xbf16, #tpu.memory_space<vmem>>, vector<128x128xbf16>
      %30 = arith.index_cast %11 : i32 to index
      %c0_17 = arith.constant 0 : index
      %31 = vector.load %arg14[%30, %c0_17] : memref<128x128xbf16, #tpu.memory_space<vmem>>, vector<128x128xbf16>
      %cst = arith.constant dense<0.000000e+00> : vector<128x128xf32>
      %32 = tpu.matmul %29, %31, %cst {dimension_numbers = #tpu.dot_dimension_numbers<[1], [0], [0], [1], [0, 0, 1, 1], [], []>} : vector<128x128xbf16>, vector<128x128xbf16>, vector<128x128xf32> -> vector<128x128xf32>
      %33 = arith.addf %28, %32 : vector<128x128xf32>
      %c0_18 = arith.constant 0 : index
      %c0_19 = arith.constant 0 : index
      %34 = vector.load %arg16[%c0_18, %c0_19] : memref<128x128xf32, #tpu.memory_space<vmem>>, vector<128x128xf32>
      tpu.vector_store %arg16[%c0_18, %c0_19], %33 {strides = array<i32>} : memref<128x128xf32, #tpu.memory_space<vmem>>, vector<128x128xf32>,
    } else {
    }
    %c1_i32 = arith.constant 1 : i32
    %15 = arith.cmpi eq, %arg0, %c1_i32 : i32
    %16 = arith.extui %15 : i1 to i32
    %c0_i32_7 = arith.constant 0 : i32
    %17 = arith.cmpi ne, %16, %c0_i32_7 : i32
    scf.if %17 {
      %c0 = arith.constant 0 : index
      %c0_14 = arith.constant 0 : index
      %28 = vector.load %arg16[%c0, %c0_14] : memref<128x128xf32, #tpu.memory_space<vmem>>, vector<128x128xf32>
      %c0_15 = arith.constant 0 : index
      %c0_16 = arith.constant 0 : index
      %29 = vector.load %arg3[%c0_15, %c0_16] : memref<128x128xbf16, #tpu.memory_space<vmem>>, vector<128x128xbf16>
      %30 = arith.index_cast %11 : i32 to index
      %c0_17 = arith.constant 0 : index
      %31 = vector.load %arg15[%30, %c0_17] : memref<128x128xbf16, #tpu.memory_space<vmem>>, vector<128x128xbf16>
      %cst = arith.constant dense<0.000000e+00> : vector<128x128xf32>
      %32 = tpu.matmul %29, %31, %cst {dimension_numbers = #tpu.dot_dimension_numbers<[1], [0], [0], [1], [0, 0, 1, 1], [], []>} : vector<128x128xbf16>, vector<128x128xbf16>, vector<128x128xf32> -> vector<128x128xf32>
      %33 = arith.addf %28, %32 : vector<128x128xf32>
      %c0_18 = arith.constant 0 : index
      %c0_19 = arith.constant 0 : index
      %34 = vector.load %arg16[%c0_18, %c0_19] : memref<128x128xf32, #tpu.memory_space<vmem>>, vector<128x128xf32>
      tpu.vector_store %arg16[%c0_18, %c0_19], %33 {strides = array<i32>} : memref<128x128xf32, #tpu.memory_space<vmem>>, vector<128x128xf32>,
    } else {
    }
    %c0_i32_8 = arith.constant 0 : i32
    %18 = arith.cmpi eq, %arg2, %c0_i32_8 : i32
    %19 = arith.extui %18 : i1 to i32
    %c0_i32_9 = arith.constant 0 : i32
    %20 = arith.cmpi ne, %19, %c0_i32_9 : i32
    scf.if %20 {
      %c128_i32_14 = arith.constant 128 : i32
      %28 = arith.muli %arg1, %c128_i32_14 : i32
      %29 = tpu.assume_multiple %28, 128 : i32
      %c0 = arith.constant 0 : index
      %c0_15 = arith.constant 0 : index
      %30 = vector.load %arg16[%c0, %c0_15] : memref<128x128xf32, #tpu.memory_space<vmem>>, vector<128x128xf32>
      %c0_16 = arith.constant 0 : index
      %c0_17 = arith.constant 0 : index
      %31 = vector.load %arg7[%c0_16, %c0_17] : memref<128x1xf32, #tpu.memory_space<vmem>>, vector<128x1xf32>
      %32 = vector.broadcast %31 : vector<128x1xf32> to vector<128x128xf32>
      %33 = arith.mulf %30, %32 : vector<128x128xf32>
      %34 = arith.truncf %33 : vector<128x128xf32> to vector<128x128xbf16>
      %c0_18 = arith.constant 0 : index
      %c0_19 = arith.constant 0 : index
      %c0_20 = arith.constant 0 : index
      %35 = vector.load %arg5[%c0_18, %c0_19, %c0_20] : memref<1x256x128xbf16, #tpu.memory_space<vmem>>, vector<1x128x128xbf16>
      %36 = vector.shape_cast %35 : vector<1x128x128xbf16> to vector<128x128xbf16>
      %c0_21 = arith.constant 0 : index
      %c128 = arith.constant 128 : index
      %c0_22 = arith.constant 0 : index
      %37 = vector.load %arg5[%c0_21, %c128, %c0_22] : memref<1x256x128xbf16, #tpu.memory_space<vmem>>, vector<1x128x128xbf16>
      %38 = vector.shape_cast %37 : vector<1x128x128xbf16> to vector<128x128xbf16>
      %c0_23 = arith.constant 0 : index
      %c0_24 = arith.constant 0 : index
      %c0_25 = arith.constant 0 : index
      %39 = vector.load %arg6[%c0_23, %c0_24, %c0_25] : memref<1x1x128xf32, #tpu.memory_space<vmem>>, vector<1x1x128xf32>
      %40 = vector.shape_cast %39 : vector<1x1x128xf32> to vector<1x128xf32>
      %c0_i32_26 = arith.constant 0 : i32
      %41 = arith.cmpi eq, %arg0, %c0_i32_26 : i32
      %42 = arith.extui %41 : i1 to i32
      %c0_i32_27 = arith.constant 0 : i32
      %43 = arith.cmpi ne, %42, %c0_i32_27 : i32
      scf.if %43 {
        %47 = arith.index_cast %29 : i32 to index
        %c0_30 = arith.constant 0 : index
        %48 = vector.load %arg14[%47, %c0_30] : memref<128x128xbf16, #tpu.memory_space<vmem>>, vector<128x128xbf16>
        %cst = arith.constant dense<0.000000e+00> : vector<128x128xf32>
        %49 = tpu.matmul %34, %36, %cst {dimension_numbers = #tpu.dot_dimension_numbers<[1], [0], [0], [1], [0, 0, 1, 1], [], []>} : vector<128x128xbf16>, vector<128x128xbf16>, vector<128x128xf32> -> vector<128x128xf32>
        %cst_31 = arith.constant dense<0.000000e+00> : vector<128x128xf32>
        %50 = tpu.matmul %48, %38, %cst_31 {dimension_numbers = #tpu.dot_dimension_numbers<[1], [0], [0], [1], [0, 0, 1, 1], [], []>} : vector<128x128xbf16>, vector<128x128xbf16>, vector<128x128xf32> -> vector<128x128xf32>
        %51 = arith.addf %49, %50 : vector<128x128xf32>
        %52 = vector.broadcast %40 : vector<1x128xf32> to vector<128x128xf32>
        %53 = arith.addf %51, %52 : vector<128x128xf32>
        %cst_32 = arith.constant 0.000000e+00 : f32
        %54 = vector.broadcast %cst_32 : f32 to vector<128x128xf32>
        %55 = arith.maximumf %53, %54 : vector<128x128xf32>
        %56 = arith.truncf %55 : vector<128x128xf32> to vector<128x128xbf16>
        %57 = arith.index_cast %29 : i32 to index
        %c0_33 = arith.constant 0 : index
        %58 = vector.load %arg15[%57, %c0_33] : memref<128x128xbf16, #tpu.memory_space<vmem>>, vector<128x128xbf16>
        tpu.vector_store %arg15[%57, %c0_33], %56 {strides = array<i32>} : memref<128x128xbf16, #tpu.memory_space<vmem>>, vector<128x128xbf16>,
      } else {
      }
      %c1_i32_28 = arith.constant 1 : i32
      %44 = arith.cmpi eq, %arg0, %c1_i32_28 : i32
      %45 = arith.extui %44 : i1 to i32
      %c0_i32_29 = arith.constant 0 : i32
      %46 = arith.cmpi ne, %45, %c0_i32_29 : i32
      scf.if %46 {
        %47 = arith.index_cast %29 : i32 to index
        %c0_30 = arith.constant 0 : index
        %48 = vector.load %arg15[%47, %c0_30] : memref<128x128xbf16, #tpu.memory_space<vmem>>, vector<128x128xbf16>
        %cst = arith.constant dense<0.000000e+00> : vector<128x128xf32>
        %49 = tpu.matmul %34, %36, %cst {dimension_numbers = #tpu.dot_dimension_numbers<[1], [0], [0], [1], [0, 0, 1, 1], [], []>} : vector<128x128xbf16>, vector<128x128xbf16>, vector<128x128xf32> -> vector<128x128xf32>
        %cst_31 = arith.constant dense<0.000000e+00> : vector<128x128xf32>
        %50 = tpu.matmul %48, %38, %cst_31 {dimension_numbers = #tpu.dot_dimension_numbers<[1], [0], [0], [1], [0, 0, 1, 1], [], []>} : vector<128x128xbf16>, vector<128x128xbf16>, vector<128x128xf32> -> vector<128x128xf32>
        %51 = arith.addf %49, %50 : vector<128x128xf32>
        %52 = vector.broadcast %40 : vector<1x128xf32> to vector<128x128xf32>
        %53 = arith.addf %51, %52 : vector<128x128xf32>
        %cst_32 = arith.constant 0.000000e+00 : f32
        %54 = vector.broadcast %cst_32 : f32 to vector<128x128xf32>
        %55 = arith.maximumf %53, %54 : vector<128x128xf32>
        %56 = arith.truncf %55 : vector<128x128xf32> to vector<128x128xbf16>
        %c0_33 = arith.constant 0 : index
        %c0_34 = arith.constant 0 : index
        %57 = vector.load %arg17[%c0_33, %c0_34] : memref<8x128xf32, #tpu.memory_space<vmem>>, vector<8x128xf32>
        %c0_35 = arith.constant 0 : index
        %c0_36 = arith.constant 0 : index
        %58 = vector.load %arg8[%c0_35, %c0_36] : memref<8x128xbf16, #tpu.memory_space<vmem>>, vector<8x128xbf16>
        %cst_37 = arith.constant dense<0.000000e+00> : vector<8x128xf32>
        %59 = tpu.matmul %58, %56, %cst_37 {dimension_numbers = #tpu.dot_dimension_numbers<[1], [0], [0], [1], [0, 0, 1, 1], [], []>} : vector<8x128xbf16>, vector<128x128xbf16>, vector<8x128xf32> -> vector<8x128xf32>
        %60 = arith.addf %57, %59 : vector<8x128xf32>
        %c0_38 = arith.constant 0 : index
        %c0_39 = arith.constant 0 : index
        %61 = vector.load %arg17[%c0_38, %c0_39] : memref<8x128xf32, #tpu.memory_space<vmem>>, vector<8x128xf32>
        tpu.vector_store %arg17[%c0_38, %c0_39], %60 {strides = array<i32>} : memref<8x128xf32, #tpu.memory_space<vmem>>, vector<8x128xf32>,
        %c0_40 = arith.constant 0 : index
        %c0_41 = arith.constant 0 : index
        %62 = vector.load %arg18[%c0_40, %c0_41] : memref<8x128xf32, #tpu.memory_space<vmem>>, vector<8x128xf32>
        %c0_42 = arith.constant 0 : index
        %c0_43 = arith.constant 0 : index
        %63 = vector.load %arg9[%c0_42, %c0_43] : memref<8x128xbf16, #tpu.memory_space<vmem>>, vector<8x128xbf16>
        %cst_44 = arith.constant dense<0.000000e+00> : vector<8x128xf32>
        %64 = tpu.matmul %63, %56, %cst_44 {dimension_numbers = #tpu.dot_dimension_numbers<[1], [0], [0], [1], [0, 0, 1, 1], [], []>} : vector<8x128xbf16>, vector<128x128xbf16>, vector<8x128xf32> -> vector<8x128xf32>
        %65 = arith.addf %62, %64 : vector<8x128xf32>
        %c0_45 = arith.constant 0 : index
        %c0_46 = arith.constant 0 : index
        %66 = vector.load %arg18[%c0_45, %c0_46] : memref<8x128xf32, #tpu.memory_space<vmem>>, vector<8x128xf32>
        tpu.vector_store %arg18[%c0_45, %c0_46], %65 {strides = array<i32>} : memref<8x128xf32, #tpu.memory_space<vmem>>, vector<8x128xf32>,
      } else {
      }
    } else {
    }
    %c1_i32_10 = arith.constant 1 : i32
    %21 = arith.cmpi eq, %arg0, %c1_i32_10 : i32
    %c0_i32_11 = arith.constant 0 : i32
    %22 = arith.cmpi eq, %arg1, %c0_i32_11 : i32
    %c0_i32_12 = arith.constant 0 : i32
    %23 = arith.cmpi eq, %arg2, %c0_i32_12 : i32
    %24 = arith.andi %22, %23 : i1
    %25 = arith.andi %21, %24 : i1
    %26 = arith.extui %25 : i1 to i32
    %c0_i32_13 = arith.constant 0 : i32
    %27 = arith.cmpi ne, %26, %c0_i32_13 : i32
    scf.if %27 {
      %c0 = arith.constant 0 : index
      %c0_14 = arith.constant 0 : index
      %28 = vector.load %arg17[%c0, %c0_14] : memref<8x128xf32, #tpu.memory_space<vmem>>, vector<8x128xf32>
      %c0_15 = arith.constant 0 : index
      %c0_16 = arith.constant 0 : index
      %29 = vector.load %arg10[%c0_15, %c0_16] : memref<8x1xf32, #tpu.memory_space<vmem>>, vector<8x1xf32>
      %30 = vector.broadcast %29 : vector<8x1xf32> to vector<8x128xf32>
      %31 = arith.mulf %28, %30 : vector<8x128xf32>
      %32 = arith.truncf %31 : vector<8x128xf32> to vector<8x128xbf16>
      %c0_17 = arith.constant 0 : index
      %c0_18 = arith.constant 0 : index
      %33 = vector.load %arg18[%c0_17, %c0_18] : memref<8x128xf32, #tpu.memory_space<vmem>>, vector<8x128xf32>
      %c0_19 = arith.constant 0 : index
      %c0_20 = arith.constant 0 : index
      %34 = vector.load %arg10[%c0_19, %c0_20] : memref<8x1xf32, #tpu.memory_space<vmem>>, vector<8x1xf32>
      %35 = vector.broadcast %34 : vector<8x1xf32> to vector<8x128xf32>
      %36 = arith.mulf %33, %35 : vector<8x128xf32>
      %37 = arith.truncf %36 : vector<8x128xf32> to vector<8x128xbf16>
      %c0_21 = arith.constant 0 : index
      %c0_22 = arith.constant 0 : index
      %38 = vector.load %arg11[%c0_21, %c0_22] : memref<256x128xbf16, #tpu.memory_space<vmem>>, vector<128x128xbf16>
      %cst = arith.constant dense<0.000000e+00> : vector<8x128xf32>
      %39 = tpu.matmul %32, %38, %cst {dimension_numbers = #tpu.dot_dimension_numbers<[1], [0], [0], [1], [0, 0, 1, 1], [], []>} : vector<8x128xbf16>, vector<128x128xbf16>, vector<8x128xf32> -> vector<8x128xf32>
      %c128 = arith.constant 128 : index
      %c0_23 = arith.constant 0 : index
      %40 = vector.load %arg11[%c128, %c0_23] : memref<256x128xbf16, #tpu.memory_space<vmem>>, vector<128x128xbf16>
      %cst_24 = arith.constant dense<0.000000e+00> : vector<8x128xf32>
      %41 = tpu.matmul %37, %40, %cst_24 {dimension_numbers = #tpu.dot_dimension_numbers<[1], [0], [0], [1], [0, 0, 1, 1], [], []>} : vector<8x128xbf16>, vector<128x128xbf16>, vector<8x128xf32> -> vector<8x128xf32>
      %42 = arith.addf %39, %41 : vector<8x128xf32>
      %c0_25 = arith.constant 0 : index
      %c0_26 = arith.constant 0 : index
      %43 = vector.load %arg12[%c0_25, %c0_26] : memref<1x128xf32, #tpu.memory_space<vmem>>, vector<1x128xf32>
      %44 = vector.broadcast %43 : vector<1x128xf32> to vector<8x128xf32>
      %45 = arith.addf %42, %44 : vector<8x128xf32>
      %c0_27 = arith.constant 0 : index
      %c0_28 = arith.constant 0 : index
      %46 = vector.load %arg13[%c0_27, %c0_28] : memref<8x128xf32, #tpu.memory_space<vmem>>, vector<8x128xf32>
      tpu.vector_store %arg13[%c0_27, %c0_28], %45 {strides = array<i32>} : memref<8x128xf32, #tpu.memory_space<vmem>>, vector<8x128xf32>,
    } else {
    }
    return
  }
  func.func @transform_0(%arg0: i32, %arg1: i32, %arg2: i32) -> (i32, i32) {
    %c0_i32 = arith.constant 0 : i32
    return %arg1, %arg2 : i32, i32
  }
  func.func @transform_2(%arg0: i32, %arg1: i32, %arg2: i32) -> (i32, i32, i32) {
    %c0_i32 = arith.constant 0 : i32
    %c0_i32_0 = arith.constant 0 : i32
    %c0_i32_1 = arith.constant 0 : i32
    return %arg0, %c0_i32, %c0_i32_0 : i32, i32, i32
  }
  func.func @transform_3(%arg0: i32, %arg1: i32, %arg2: i32) -> (i32, i32, i32) {
    %c0_i32 = arith.constant 0 : i32
    %c0_i32_0 = arith.constant 0 : i32
    %c0_i32_1 = arith.constant 0 : i32
    return %arg0, %c0_i32, %c0_i32_0 : i32, i32, i32
  }
  func.func @transform_4(%arg0: i32, %arg1: i32, %arg2: i32) -> (i32, i32) {
    %c0_i32 = arith.constant 0 : i32
    %c0_i32_0 = arith.constant 0 : i32
    return %arg1, %c0_i32 : i32, i32
  }
  func.func @transform_5(%arg0: i32, %arg1: i32, %arg2: i32) -> (i32, i32) {
    %c0_i32 = arith.constant 0 : i32
    %c0_i32_0 = arith.constant 0 : i32
    return %c0_i32, %arg1 : i32, i32
  }
  func.func @transform_6(%arg0: i32, %arg1: i32, %arg2: i32) -> (i32, i32) {
    %c0_i32 = arith.constant 0 : i32
    %c0_i32_0 = arith.constant 0 : i32
    return %c0_i32, %arg1 : i32, i32
  }
  func.func @transform_7(%arg0: i32, %arg1: i32, %arg2: i32) -> (i32, i32) {
    %c0_i32 = arith.constant 0 : i32
    %c0_i32_0 = arith.constant 0 : i32
    %c0_i32_1 = arith.constant 0 : i32
    return %c0_i32, %c0_i32_0 : i32, i32
  }
  func.func @transform_8(%arg0: i32, %arg1: i32, %arg2: i32) -> (i32, i32) {
    %c0_i32 = arith.constant 0 : i32
    %c0_i32_0 = arith.constant 0 : i32
    %c0_i32_1 = arith.constant 0 : i32
    return %c0_i32, %c0_i32_0 : i32, i32
  }
  func.func @transform_9(%arg0: i32, %arg1: i32, %arg2: i32) -> (i32, i32) {
    %c0_i32 = arith.constant 0 : i32
    %c0_i32_0 = arith.constant 0 : i32
    %c0_i32_1 = arith.constant 0 : i32
    return %c0_i32, %c0_i32_0 : i32, i32
  }
  func.func @transform_10(%arg0: i32, %arg1: i32, %arg2: i32) -> (i32, i32) {
    %c0_i32 = arith.constant 0 : i32
    %c0_i32_0 = arith.constant 0 : i32
    %c0_i32_1 = arith.constant 0 : i32
    return %c0_i32, %c0_i32_0 : i32, i32
  }
}

</mosaic_0001>

<bundles_post_ra>
// kernel: tpu_custom_call.1
= control target key start
LH: loop header
LB: loop body
LE: loop exit
PB: predicated region body
PF: predicated region fallthrough
CT: control target
= control target key end

     0   :  { %s3805_s0 = inlined_call_operand.hbm [shape: bf16[128,128], index: 0, kind: input, shape index: {}]   ;;  %s3806_s1 = inlined_call_operand.hbm [shape: bf16[128,128], index: 1, kind: input, shape index: {}]   ;;  %s3807_s2 = inlined_call_operand.hbm [shape: bf16[2,256,128], index: 2, kind: input, shape index: {}]   ;;  %s3808_s3 = inlined_call_operand.vmem [shape: f32[2,1,128], index: 3, kind: input, shape index: {}]   ;;  %s3809_s4 = inlined_call_operand.vmem [shape: f32[128,1], index: 4, kind: input, shape index: {}]   ;;  %s3810_s5 = inlined_call_operand.vmem [shape: bf16[8,128], index: 5, kind: input, shape index: {}]   ;;  %s3811_s6 = inlined_call_operand.vmem [shape: bf16[8,128], index: 6, kind: input, shape index: {}]   ;;  %s3812_s7 = inlined_call_operand.vmem [shape: f32[8,1], index: 7, kind: input, shape index: {}]   ;;  %s3813_s8 = inlined_call_operand.vmem [shape: bf16[256,128], index: 8, kind: input, shape index: {}]   ;;  %s3814_s9 = inlined_call_operand.vmem [shape: f32[1,128], index: 9, kind: input, shape index: {}]   ;;  %s3815_s10 = inlined_call_operand.hbm [shape: f32[8,128], index: 10, kind: output, shape index: {}]  }
   0x1   :  { %3824 = sst [smem:[#allocation23_spill]] %s3814_s9 }
   0x2   :  { %3825 = sst [smem:[#allocation24_spill]] %s3815_s10 }
   0x3   :  { %15 = vsyncpa [#allocation9], 0 }
   0x4   :  { %16 = vsyncpa [#allocation12], 0 }
   0x5   :  { %18 = vsyncpa [#allocation12 + $0x1], 0 }
   0x6   :  { %19 = vsyncpa [#allocation10], 0  ;;  %s3229_s13 = smov 0   ;;  %s3231_s14 = smov 0  }
   0x7   :  { %s3233_s15 = smov 0   ;;  %s3235_s16 = smov 0  }
   0x8   :  { %s3237_s17 = smov 0   ;;  %s3239_s18 = smov 0  }
   0x9 LB: > { %s3820_s19 = sadd.s32 4294967295, %s3158_s18   ;;  %p92_p0 = scmp.ne.s32.totalorder %s3142_s14, %s3138_s13  ;;  %s3158_s18 = sphi %s3239_s18, %s25_s18   ;;  %s3154_s17 = sphi %s3237_s17, %s3846_s17   ;;  %s3150_s16 = sphi %s3235_s16, %s3845_s16   ;;  %s3146_s15 = sphi %s3233_s15, %s3844_s15   ;;  %s3142_s14 = sphi %s3231_s14, %s3843_s14   ;;  %s3138_s13 = sphi %s3229_s13, %s3842_s13  }
   0xa   : > { %p3261_p1 = scmp.eq.s32.totalorder %s3820_s19, 0  ;;  %p2314_p2 = scmp.ge.s32.totalorder %s3158_s18, 1 }
   0xb   : > { %p291_p3 = scmp.lt.s32.totalorder %s3158_s18, 3  ;;  %s3160_s23 = smov [#allocation8]  }
   0xc   : > { %s3826_s20 = scalar_select %p3261_p1, 1, 0 }
   0xd   : > { %p3269_p4 = por %p3261_p1, %p92_p0  ;;  %p3273_p5 = pnand %p2314_p2, %p291_p3 }
   0xe   : > { %s307_s24 = sshll.u32 %s3160_s23, 4  ;;  %s44_s26 = sadd.s32 1, %s3154_s17  ;;  %s308_s24 = int_to_ptr.vmem [resolvable:$true] %s307_s24 }
   0xf   : > { %s3827_s21 = scalar_select %p3269_p4, 1, 0 }
  0x10   : > { %s3828_s22 = scalar_select %p3273_p5, 1, 0 }
  0x11   : > { %p2883_p6 = pneg %p3273_p5  ;;  %s2992_s29 = scalar_lea.hbm %s3805_s0, 1024 }
  0x12   : > { %p2993_p8 = scmp.ne.s32.totalorder %s3805_s0, %s2992_s29  ;;  %p2999_p12 = scmp.lt.u32.totalorder %s2992_s29, %s3805_s0 }
  0x13   : > { %p3281_p7 = pnand %p2883_p6, %p3261_p1 }
  0x15   : > { %p2994_p9 = pneg %p3281_p7 }
  0x17   : > { %p2995_p10 = pnand %p2994_p9, %p2993_p8 }
  0x19   : > { %p2996_p11 = pneg %p2995_p10 }
  0x1b   : > { %p3001_p13 = pnand %p2999_p12, %p2996_p11 }
  0x1d   : > { %3004 = shalt.err (!%p3001_p13)
}
  0x1e   : > { %s3005_s23 = scalar_lea.vmem %s308_s24, 1024  ;;  %p3013_p6 = scmp.lt.s32.totalorder %s308_s24, %s308_s24 }
  0x1f   : > { %p3006_p0 = scmp.ne.s32.totalorder %s308_s24, %s3005_s23  ;;  %p3014_p4 = scmp.lt.s32.totalorder %s3005_s23, %s3005_s23 }
  0x21   : > { %p3008_p2 = pnand %p3006_p0, %p2994_p9  ;;  %p3015_p1 = por %p3014_p4, %p3013_p6 }
  0x23   : > { %p3009_p3 = pneg %p3008_p2 }
  0x25   : > { %p3016_p5 = pnand %p3015_p1, %p3009_p3 }
  0x27   : > { %3019 = shalt.err (!%p3016_p5)
}
  0x28   : > { %s3822_s27 = smov 64   ;;  %s3162_s28 = smov 4  }
  0x29   : > { %2886 = dma.hbm_to_vmem [thread:$0]  (!%p3281_p7), %s3805_s0, 1024, %s308_s24, [#allocation9], %s3822_s27, %s3822_s27, %s3162_s28  }
  0x2a   : > { %p46_p1 = scmp.ge.s32.totalorder %s44_s26, 2  ;;  %s79_s11 = sadd.s32 1, %s3146_s15 }
  0x2b   : > { %p86_p4 = scmp.ne.s32.totalorder %s3146_s15, %s3142_s14  ;;  %p87_p5 = scmp.eq.s32.totalorder %s3158_s18, 0 }
  0x2c   : > { %s3848_s26 = smov (%p46_p1, %s44_s26), 0  ;;  %p2892_p9 = scmp.lt.s32.totalorder %s3158_s18, 2 }
  0x2d   : > { %p88_p8 = por %p87_p5, %p86_p4  ;;  %s76_s12 = ssub.s32 %s3154_s17, %s3848_s26 }
  0x2e   : > { %s353_s13 = sand.u32 1, %s3146_s15   ;;  %p77_p10 = scmp.eq.s32.totalorder %s76_s12, 0 }
  0x2f   : > { %s2320_s25 = sshll.u32 %s353_s13, 7  ;;  %s2402_s23 = sshll.u32 %s3154_s17, 11 }
  0x30   : > { %s3317_s19 = scalar_select %p77_p10, %s3146_s15, %s79_s11  }
  0x31   : > { %s3322_s24 = scalar_lea.hbm %s3807_s2, %s2402_s23  ;;  %s357_s29 = scalar_lea.vmem [#allocation11], %s2320_s25 }
  0x32   : > { %s364_s30 = sshll.u32 %s357_s29, 4  ;;  %p3324_p7 = pnand %p2892_p9, %p88_p8  ;;  %s3328_s30 = int_to_ptr.vmem [resolvable:$true] %s364_s30 }
  0x33   : > { %s3330_s11 = scalar_lea.sflag [#allocation12], %s353_s13  ;;  %s3020_s12 = scalar_lea.hbm %s3322_s24, 2048 }
  0x34   : > { %p3021_p11 = scmp.ne.s32.totalorder %s3322_s24, %s3020_s12  ;;  %p3022_p12 = pneg %p3324_p7 }
  0x35   : > { %s3025_s25 = scalar_lea.hbm %s3807_s2, 4096  ;;  %p3026_p2 = scmp.lt.u32.totalorder %s3322_s24, %s3807_s2 }
  0x36   : > { %p3023_p13 = pnand %p3022_p12, %p3021_p11  ;;  %p3027_p3 = scmp.lt.u32.totalorder %s3025_s25, %s3020_s12 }
  0x37   : > { %p3029_p1 = scmp.lt.u32.totalorder %s3020_s12, %s3322_s24 }
  0x38   : > { %p3024_p0 = pneg %p3023_p13  ;;  %p3028_p6 = por %p3027_p3, %p3026_p2 }
  0x3a   : > { %p3030_p4 = por %p3029_p1, %p3028_p6 }
  0x3c   : > { %p3031_p5 = pnand %p3030_p4, %p3024_p0 }
  0x3e   : > { %3034 = shalt.err (!%p3031_p5)
}
  0x3f   : > { %s3035_s13 = scalar_lea.vmem %s3328_s30, 2048  ;;  %s3163_s9 = smov [#allocation11]  }
  0x40   : > { %p3036_p8 = scmp.ne.s32.totalorder %s3328_s30, %s3035_s13  ;;  %s3040_s10 = sshll.u32 %s3163_s9, 4  ;;  %s3041_s10 = int_to_ptr.vmem [resolvable:$false] %s3040_s10 }
  0x41   : > { %s3042_s23 = scalar_lea.vmem %s3041_s10, 4096  ;;  %p3043_p11 = scmp.lt.s32.totalorder %s3328_s30, %s3041_s10 }
  0x42   : > { %p3038_p9 = pnand %p3036_p8, %p3022_p12  ;;  %p3044_p13 = scmp.lt.s32.totalorder %s3042_s23, %s3035_s13 }
  0x44   : > { %p3039_p10 = pneg %p3038_p9  ;;  %p3045_p2 = por %p3044_p13, %p3043_p11 }
  0x46   : > { %p3046_p3 = pnand %p3045_p2, %p3039_p10 }
  0x48   : > { %3049 = shalt.err (!%p3046_p3)
}
  0x49   : > { %s3831_s12 = smov 64   ;;  %p3832_p12 = scmp.ne.s32.totalorder %s3828_s22, 0 }
  0x4a   : > { %2890 = dma.hbm_to_vmem [thread:$0]  (!%p3324_p7), %s3322_s24, 2048, %s3328_s30, %s3330_s11, %s3831_s12, %s3831_s12, %s3162_s28  }
  0x4b   : > { %382 = sbr.rel (%p3832_p12) target bundleno = 2008 (0x7d8), region = 56 }
  0x52   : > { %p3833_p0 = scmp.ne.s32.totalorder %s3826_s20, 0 }
  0x54   : > { %3123 = dma.done.wait (%p3833_p0), [#allocation9], 1024  }
  0x55   : > { %3125 = vsyncadd (%p3833_p0), [#allocation9], 4294966272  ;;  %s388_s25 = sand.u32 1, %s3142_s14   ;;  %p3834_p6 = scmp.ne.s32.totalorder %s3827_s21, 0 }
  0x56   : > { %s2325_s27 = sshll.u32 %s388_s25, 7  ;;  %s389_s29 = scalar_lea.sflag [#allocation12], %s388_s25 }
  0x57   : > { %s3368_s13 = scalar_lea.vmem [#allocation11], %s2325_s27 }
  0x58   : > { %3127 = dma.done.wait (%p3834_p6), %s389_s29, 2048  }
  0x59   : > { %3129 = vsyncadd (%p3834_p6), %s389_s29, 4294965248  ;;  %p439_p7 = scmp.lt.s32.totalorder %s3150_s16, 1  ;;  %p457_p1 = scmp.eq.s32.totalorder %s3150_s16, 0 }
  0x5a   : > { %s3164_s30 = smov (%p457_p1), [#allocation2]   ;;  %s3050_s21 = scalar_lea.hbm (%p457_p1), %s3806_s1, 1024 }
  0x5b   : > { %s3377_s22 = scalar_select %p439_p7, %s3150_s16, 1 }
  0x5c   : > { %465 = sbr.rel (!%p457_p1) target bundleno = 112 (0x70), region = 68  ;;  %s473_s11 = sshll.u32 (%p457_p1), %s3164_s30, 4  ;;  %s474_s11 = int_to_ptr.vmem [resolvable:$true] %s473_s11 }
  0x5d   : > { %s441_s24 = scalar_lea.vmem %s3808_s3, %s3377_s22  ;;  %p3051_p4 = scmp.ne.s32.totalorder (%p457_p1), %s3806_s1, %s3050_s21 }
  0x5e   : > { %p3054_p5 = scmp.lt.u32.totalorder (%p457_p1), %s3050_s21, %s3806_s1 }
  0x60   : > { %p3056_p8 = pnand (%p457_p1), %p3054_p5, %p3051_p4 }
  0x63   : > { %3059 = shalt.err (!%p3056_p8)  }
  0x64   : > { %s3060_s29 = scalar_lea.vmem %s474_s11, 1024  ;;  %p3065_p10 = scmp.lt.s32.totalorder %s474_s11, %s474_s11 }
  0x65   : > { %p3061_p9 = scmp.ne.s32.totalorder %s474_s11, %s3060_s29  ;;  %p3066_p11 = scmp.lt.s32.totalorder %s3060_s29, %s3060_s29 }
  0x67   : > { %p3067_p13 = por %p3066_p11, %p3065_p10 }
  0x69   : > { %p3068_p2 = pnand %p3067_p13, %p3061_p9 }
  0x6b   : > { %3071 = shalt.err (!%p3068_p2)  }
  0x6c   : > { %476 = dma.hbm_to_vmem [thread:$0]  %s3806_s1, 1024, %s474_s11, [#allocation7] }
  0x6d   : > { %3130 = dma.done.wait [#allocation7], 1024 }
  0x6e   : > { %3131 = vsyncadd [#allocation7], 4294966272  ;;  %v3165_v0 = vmov 0.0  }
  0x6f   : > { %481 = vst [vmem:[#allocation5] sm:$0xff] %v3165_v0  ;;  %482 = vst [vmem:[#allocation6] sm:$0xff] %v3165_v0 }
  0x70 PF: > { %v3166_v1 = vmov 0.0   ;;  %p2327_p3 = scmp.ne.s32.totalorder %s3150_s16, 0 }
  0x71   : > { %486 = vst [vmem:[#allocation4] sm:$0xff] %v3166_v1  ;;  %487 = vst [vmem:[#allocation4 + $0x8] sm:$0xff] %v3166_v1  ;;  %v542_v2 = vld [vmem:[#allocation2] sm:$0xff] (!%p2327_p3)  ;;  %v543_v3 = vld [vmem:[#allocation2 + $0x8] sm:$0xff] (!%p2327_p3) }
  0x72   : > { %488 = vst [vmem:[#allocation4 + $0x10] sm:$0xff] %v3166_v1  ;;  %489 = vst [vmem:[#allocation4 + $0x18] sm:$0xff] %v3166_v1  ;;  %505 = sbr.rel (%p2327_p3) target bundleno = 372 (0x174), region = 80  ;;  %2537 = vmatprep.subr.bf16.mxu0 (!%p2327_p3), %v542_v2  ;;  %2809 = vmatprep.subr.bf16.mxu1 (!%p2327_p3), %v542_v2  ;;  %v544_v4 = vld [vmem:[#allocation2 + $0x10] sm:$0xff] (!%p2327_p3)  ;;  %v545_v7 = vld [vmem:[#allocation2 + $0x18] sm:$0xff] (!%p2327_p3) }
  0x73   : > { %490 = vst [vmem:[#allocation4 + $0x20] sm:$0xff] %v3166_v1  ;;  %491 = vst [vmem:[#allocation4 + $0x28] sm:$0xff] %v3166_v1  ;;  %2538 = vmatpush3.bf16.msra.mxu0 (!%p2327_p3), %v542_v2  ;;  %2817 = vmatpush3.bf16.msra.mxu1 (!%p2327_p3), %v542_v2  ;;  %v2957_v5 = vld [vmem:[#allocation8] sm:$0xff] (!%p2327_p3)   ;;  %v546_v8 = vld [vmem:[#allocation2 + $0x20] sm:$0xff] (!%p2327_p3) }
  0x74   : > { %492 = vst [vmem:[#allocation4 + $0x30] sm:$0xff] %v3166_v1  ;;  %493 = vst [vmem:[#allocation4 + $0x38] sm:$0xff] %v3166_v1  ;;  %2539 = vmatprep.subr.bf16.mxu0 (!%p2327_p3), %v543_v3  ;;  %2810 = vmatprep.subr.bf16.mxu1 (!%p2327_p3), %v543_v3  ;;  %v2958_v6 = vld [vmem:[#allocation8 + $0x20] sm:$0xff] (!%p2327_p3)   ;;  %v547_v9 = vld [vmem:[#allocation2 + $0x28] sm:$0xff] (!%p2327_p3) }
  0x75   : > { %494 = vst [vmem:[#allocation4 + $0x40] sm:$0xff] %v3166_v1  ;;  %495 = vst [vmem:[#allocation4 + $0x48] sm:$0xff] %v3166_v1  ;;  %2553 = vmatprep.mubr.bf16.mxu0 (!%p2327_p3), %v2957_v5  ;;  %2561 = vmatprep.mubr.bf16.mxu1 (!%p2327_p3), %v2958_v6  ;;  %v548_v10 = vld [vmem:[#allocation2 + $0x30] sm:$0xff] (!%p2327_p3)  ;;  %v549_v11 = vld [vmem:[#allocation2 + $0x38] sm:$0xff] (!%p2327_p3) }
  0x76   : > { %496 = vst [vmem:[#allocation4 + $0x50] sm:$0xff] %v3166_v1  ;;  %497 = vst [vmem:[#allocation4 + $0x58] sm:$0xff] %v3166_v1  ;;  %v2959_v12 = vld [vmem:[#allocation8 + $0x8] sm:$0xff] (!%p2327_p3)   ;;  %v2961_v14 = vld [vmem:[#allocation8 + $0x10] sm:$0xff] (!%p2327_p3)  }
  0x77   : > { %498 = vst [vmem:[#allocation4 + $0x60] sm:$0xff] %v3166_v1  ;;  %499 = vst [vmem:[#allocation4 + $0x68] sm:$0xff] %v3166_v1  ;;  %2540 = vmatpush3.bf16.msra.mxu0 (!%p2327_p3), %v543_v3  ;;  %2818 = vmatpush3.bf16.msra.mxu1 (!%p2327_p3), %v543_v3  ;;  %v2960_v13 = vld [vmem:[#allocation8 + $0x28] sm:$0xff] (!%p2327_p3)   ;;  %v2962_v15 = vld [vmem:[#allocation8 + $0x30] sm:$0xff] (!%p2327_p3)  }
  0x78   : > { %500 = vst [vmem:[#allocation4 + $0x70] sm:$0xff] %v3166_v1  ;;  %501 = vst [vmem:[#allocation4 + $0x78] sm:$0xff] %v3166_v1  ;;  %2541 = vmatprep.subr.bf16.mxu0 (!%p2327_p3), %v544_v4  ;;  %2811 = vmatprep.subr.bf16.mxu1 (!%p2327_p3), %v544_v4  ;;  %v2963_v16 = vld [vmem:[#allocation8 + $0x18] sm:$0xff] (!%p2327_p3)   ;;  %v506_v20 = vld [vmem:[#allocation4] sm:$0xff] (!%p2327_p3) }
  0x79   : > { %v2964_v17 = vld [vmem:[#allocation8 + $0x38] sm:$0xff]   ;;  %v508_v18 = vld [vmem:[#allocation4 + $0x10] sm:$0xff]  ;;  %v509_v24 = vld [vmem:[#allocation4 + $0x18] sm:$0xff] }
  0x7a   : > { %v507_v30 = vld [vmem:[#allocation4 + $0x8] sm:$0xff]  ;;  %v510_v44 = vld [vmem:[#allocation4 + $0x20] sm:$0xff] }
  0x7b   : > { %2542 = vmatpush3.bf16.msra.mxu0 %v544_v4  ;;  %2819 = vmatpush3.bf16.msra.mxu1 %v544_v4  ;;  %v512_v42 = vld [vmem:[#allocation4 + $0x30] sm:$0xff]  ;;  %v513_v48 = vld [vmem:[#allocation4 + $0x38] sm:$0xff]  ;;  %v511_v54 = vld [vmem:[#allocation4 + $0x28] sm:$0xff] }
  0x7c   : > { %2543 = vmatprep.subr.bf16.mxu0 %v545_v7  ;;  %2812 = vmatprep.subr.bf16.mxu1 %v545_v7  ;;  %v514_v21 = vld [vmem:[#allocation4 + $0x40] sm:$0xff]  ;;  %v515_v31 = vld [vmem:[#allocation4 + $0x48] sm:$0xff] }
  0x7d   : > { %v516_v19 = vld [vmem:[#allocation4 + $0x50] sm:$0xff]  ;;  %v517_v25 = vld [vmem:[#allocation4 + $0x58] sm:$0xff] }
  0x7e   : > { %v518_v45 = vld [vmem:[#allocation4 + $0x60] sm:$0xff]  ;;  %v519_v55 = vld [vmem:[#allocation4 + $0x68] sm:$0xff] }
  0x7f   : > { %2544 = vmatpush3.bf16.msra.mxu0 %v545_v7  ;;  %2820 = vmatpush3.bf16.msra.mxu1 %v545_v7  ;;  %v520_v43 = vld [vmem:[#allocation4 + $0x70] sm:$0xff]  ;;  %v521_v49 = vld [vmem:[#allocation4 + $0x78] sm:$0xff] }
  0x80   : > { %2545 = vmatprep.subr.bf16.mxu0 %v546_v8  ;;  %2813 = vmatprep.subr.bf16.mxu1 %v546_v8 }
  0x83   : > { %2546 = vmatpush3.bf16.msra.mxu0 %v546_v8  ;;  %2821 = vmatpush3.bf16.msra.mxu1 %v546_v8 }
  0x84   : > { %2547 = vmatprep.subr.bf16.mxu0 %v547_v9  ;;  %2814 = vmatprep.subr.bf16.mxu1 %v547_v9 }
  0x87   : > { %2548 = vmatpush3.bf16.msra.mxu0 %v547_v9  ;;  %2822 = vmatpush3.bf16.msra.mxu1 %v547_v9 }
  0x88   : > { %2549 = vmatprep.subr.bf16.mxu0 %v548_v10  ;;  %2815 = vmatprep.subr.bf16.mxu1 %v548_v10 }
  0x8b   : > { %2550 = vmatpush3.bf16.msra.mxu0 %v548_v10  ;;  %2823 = vmatpush3.bf16.msra.mxu1 %v548_v10 }
  0x8c   : > { %2551 = vmatprep.subr.bf16.mxu0 %v549_v11  ;;  %2816 = vmatprep.subr.bf16.mxu1 %v549_v11 }
  0x8f   : > { %2552 = vmatpush3.bf16.msra.mxu0 %v549_v11  ;;  %2824 = vmatpush3.bf16.msra.mxu1 %v549_v11 }
  0x92   : > { %2554 = vmatmul.mubr.bf16.vlgmr.msra.gmra.mrb[0].mxu0 %v2959_v12  ;;  %2562 = vmatmul.mubr.bf16.vlgmr.msra.gmra.mrb[0].mxu1 %v2960_v13 }
  0x93   : > { %2557 = vmatprep.mubr.bf16.mxu0 %v2961_v14  ;;  %2565 = vmatprep.mubr.bf16.mxu1 %v2962_v15 }
  0x9a   : > { %2558 = vmatmul.mubr.bf16.gmra.mrb[4].mxu0 %v2963_v16  ;;  %2566 = vmatmul.mubr.bf16.gmra.mrb[4].mxu1 %v2964_v17 }
 0x165   : > { %v2555_v22 = vpop.f32.mrb[0].mxu0  ;;  %v2563_v23 = vpop.f32.mrb[0].mxu1 }
 0x166   : > { %v697_v26 = vadd.f32 %v2555_v22, %v508_v18  ;;  %v705_v27 = vadd.f32 %v2563_v23, %v516_v19  ;;  %v632_v28 = vpop.f32.mrb[1].mxu0  ;;  %v664_v29 = vpop.f32.mrb[1].mxu1 }
 0x167   : > { %v695_v32 = vadd.f32 %v632_v28, %v506_v20  ;;  %v703_v33 = vadd.f32 %v664_v29, %v514_v21  ;;  %v2556_v34 = vpop.f32.mrb[2].mxu0  ;;  %v2564_v35 = vpop.f32.mrb[2].mxu1 }
 0x168   : > { %713 = vst [vmem:[#allocation4 + $0x10] sm:$0xff] %v697_v26  ;;  %721 = vst [vmem:[#allocation4 + $0x50] sm:$0xff] %v705_v27  ;;  %v698_v36 = vadd.f32 %v2556_v34, %v509_v24  ;;  %v706_v37 = vadd.f32 %v2564_v35, %v517_v25  ;;  %v635_v38 = vpop.f32.mrb[3].mxu0  ;;  %v667_v39 = vpop.f32.mrb[3].mxu1 }
 0x169   : > { %711 = vst [vmem:[#allocation4] sm:$0xff] %v695_v32  ;;  %719 = vst [vmem:[#allocation4 + $0x40] sm:$0xff] %v703_v33  ;;  %v696_v40 = vadd.f32 %v635_v38, %v507_v30  ;;  %v704_v41 = vadd.f32 %v667_v39, %v515_v31 }
 0x16a   : > { %714 = vst [vmem:[#allocation4 + $0x18] sm:$0xff] %v698_v36  ;;  %722 = vst [vmem:[#allocation4 + $0x58] sm:$0xff] %v706_v37 }
 0x16b   : > { %712 = vst [vmem:[#allocation4 + $0x8] sm:$0xff] %v696_v40  ;;  %720 = vst [vmem:[#allocation4 + $0x48] sm:$0xff] %v704_v41 }
 0x16d   : > { %v2559_v46 = vpop.f32.mrb[4].mxu0  ;;  %v2567_v47 = vpop.f32.mrb[4].mxu1 }
 0x16e   : > { %v701_v50 = vadd.f32 %v2559_v46, %v512_v42  ;;  %v709_v51 = vadd.f32 %v2567_v47, %v520_v43  ;;  %v648_v52 = vpop.f32.mrb[5].mxu0  ;;  %v680_v53 = vpop.f32.mrb[5].mxu1 }
 0x16f   : > { %v699_v56 = vadd.f32 %v648_v52, %v510_v44  ;;  %v707_v57 = vadd.f32 %v680_v53, %v518_v45  ;;  %v2560_v58 = vpop.f32.mrb[6].mxu0  ;;  %v2568_v59 = vpop.f32.mrb[6].mxu1 }
 0x170   : > { %717 = vst [vmem:[#allocation4 + $0x30] sm:$0xff] %v701_v50  ;;  %725 = vst [vmem:[#allocation4 + $0x70] sm:$0xff] %v709_v51  ;;  %v702_v60 = vadd.f32 %v2560_v58, %v513_v48  ;;  %v710_v61 = vadd.f32 %v2568_v59, %v521_v49  ;;  %v651_v62 = vpop.f32.mrb[7].mxu0  ;;  %v683_v63 = vpop.f32.mrb[7].mxu1 }
 0x171   : > { %715 = vst [vmem:[#allocation4 + $0x20] sm:$0xff] %v699_v56  ;;  %723 = vst [vmem:[#allocation4 + $0x60] sm:$0xff] %v707_v57  ;;  %v700_v0 = vadd.f32 %v651_v62, %v511_v54  ;;  %v708_v1 = vadd.f32 %v683_v63, %v519_v55 }
 0x172   : > { %718 = vst [vmem:[#allocation4 + $0x38] sm:$0xff] %v702_v60  ;;  %726 = vst [vmem:[#allocation4 + $0x78] sm:$0xff] %v710_v61 }
 0x173   : > { %716 = vst [vmem:[#allocation4 + $0x28] sm:$0xff] %v700_v0  ;;  %724 = vst [vmem:[#allocation4 + $0x68] sm:$0xff] %v708_v1 }
 0x174 PF: > { %p727_p12 = scmp.eq.s32.totalorder %s3150_s16, 1  ;;  %p2336_p0 = scmp.ne.s32.totalorder %s3150_s16, 1 }
 0x175   : > { %v767_v2 = vld [vmem:[#allocation3] sm:$0xff] (!%p2336_p0)  ;;  %v768_v3 = vld [vmem:[#allocation3 + $0x8] sm:$0xff] (!%p2336_p0)  ;;  %v769_v4 = vld [vmem:[#allocation3 + $0x10] sm:$0xff] (!%p2336_p0) }
 0x176   : > { %730 = sbr.rel (%p2336_p0) target bundleno = 632 (0x278), region = 84  ;;  %2569 = vmatprep.subr.bf16.mxu0 (!%p2336_p0), %v767_v2  ;;  %2825 = vmatprep.subr.bf16.mxu1 (!%p2336_p0), %v767_v2  ;;  %v2965_v5 = vld [vmem:[#allocation8] sm:$0xff] (!%p2336_p0)   ;;  %v770_v7 = vld [vmem:[#allocation3 + $0x18] sm:$0xff] (!%p2336_p0)  ;;  %v771_v8 = vld [vmem:[#allocation3 + $0x20] sm:$0xff] (!%p2336_p0) }
 0x177   : > { %2570 = vmatpush3.bf16.msra.mxu0 (!%p2336_p0), %v767_v2  ;;  %2833 = vmatpush3.bf16.msra.mxu1 (!%p2336_p0), %v767_v2  ;;  %v2966_v6 = vld [vmem:[#allocation8 + $0x20] sm:$0xff] (!%p2336_p0)   ;;  %v772_v9 = vld [vmem:[#allocation3 + $0x28] sm:$0xff] (!%p2336_p0)  ;;  %v774_v11 = vld [vmem:[#allocation3 + $0x38] sm:$0xff] (!%p2336_p0) }
 0x178   : > { %2571 = vmatprep.subr.bf16.mxu0 (!%p2336_p0), %v768_v3  ;;  %2826 = vmatprep.subr.bf16.mxu1 (!%p2336_p0), %v768_v3  ;;  %v773_v10 = vld [vmem:[#allocation3 + $0x30] sm:$0xff] (!%p2336_p0)  ;;  %v2967_v12 = vld [vmem:[#allocation8 + $0x8] sm:$0xff] (!%p2336_p0)   ;;  %v2969_v14 = vld [vmem:[#allocation8 + $0x10] sm:$0xff] (!%p2336_p0)  }
 0x179   : > { %2585 = vmatprep.mubr.bf16.mxu0 (!%p2336_p0), %v2965_v5  ;;  %2593 = vmatprep.mubr.bf16.mxu1 (!%p2336_p0), %v2966_v6  ;;  %v2968_v13 = vld [vmem:[#allocation8 + $0x28] sm:$0xff] (!%p2336_p0)   ;;  %v2970_v15 = vld [vmem:[#allocation8 + $0x30] sm:$0xff] (!%p2336_p0)   ;;  %v2971_v16 = vld [vmem:[#allocation8 + $0x18] sm:$0xff] (!%p2336_p0)  }
 0x17a   : > { %v2972_v17 = vld [vmem:[#allocation8 + $0x38] sm:$0xff] (!%p2336_p0)   ;;  %v733_v18 = vld [vmem:[#allocation4 + $0x10] sm:$0xff] (!%p2336_p0)  ;;  %v731_v20 = vld [vmem:[#allocation4] sm:$0xff] (!%p2336_p0) }
 0x17b   : > { %2572 = vmatpush3.bf16.msra.mxu0 (!%p2336_p0), %v768_v3  ;;  %2834 = vmatpush3.bf16.msra.mxu1 (!%p2336_p0), %v768_v3  ;;  %v741_v19 = vld [vmem:[#allocation4 + $0x50] sm:$0xff] (!%p2336_p0)  ;;  %v739_v21 = vld [vmem:[#allocation4 + $0x40] sm:$0xff] (!%p2336_p0)  ;;  %v734_v24 = vld [vmem:[#allocation4 + $0x18] sm:$0xff] (!%p2336_p0) }
 0x17c   : > { %2573 = vmatprep.subr.bf16.mxu0 (!%p2336_p0), %v769_v4  ;;  %2827 = vmatprep.subr.bf16.mxu1 (!%p2336_p0), %v769_v4  ;;  %v742_v25 = vld [vmem:[#allocation4 + $0x58] sm:$0xff] (!%p2336_p0)  ;;  %v732_v30 = vld [vmem:[#allocation4 + $0x8] sm:$0xff] (!%p2336_p0)  ;;  %v737_v42 = vld [vmem:[#allocation4 + $0x30] sm:$0xff] (!%p2336_p0) }
 0x17d   : > { %v740_v31 = vld [vmem:[#allocation4 + $0x48] sm:$0xff]  ;;  %v745_v43 = vld [vmem:[#allocation4 + $0x70] sm:$0xff]  ;;  %v735_v44 = vld [vmem:[#allocation4 + $0x20] sm:$0xff] }
 0x17e   : > { %v743_v45 = vld [vmem:[#allocation4 + $0x60] sm:$0xff]  ;;  %v738_v48 = vld [vmem:[#allocation4 + $0x38] sm:$0xff]  ;;  %v736_v54 = vld [vmem:[#allocation4 + $0x28] sm:$0xff] }
 0x17f   : > { %2574 = vmatpush3.bf16.msra.mxu0 %v769_v4  ;;  %2835 = vmatpush3.bf16.msra.mxu1 %v769_v4  ;;  %v746_v49 = vld [vmem:[#allocation4 + $0x78] sm:$0xff]  ;;  %v744_v55 = vld [vmem:[#allocation4 + $0x68] sm:$0xff] }
 0x180   : > { %2575 = vmatprep.subr.bf16.mxu0 %v770_v7  ;;  %2828 = vmatprep.subr.bf16.mxu1 %v770_v7 }
 0x183   : > { %2576 = vmatpush3.bf16.msra.mxu0 %v770_v7  ;;  %2836 = vmatpush3.bf16.msra.mxu1 %v770_v7 }
 0x184   : > { %2577 = vmatprep.subr.bf16.mxu0 %v771_v8  ;;  %2829 = vmatprep.subr.bf16.mxu1 %v771_v8 }
 0x187   : > { %2578 = vmatpush3.bf16.msra.mxu0 %v771_v8  ;;  %2837 = vmatpush3.bf16.msra.mxu1 %v771_v8 }
 0x188   : > { %2579 = vmatprep.subr.bf16.mxu0 %v772_v9  ;;  %2830 = vmatprep.subr.bf16.mxu1 %v772_v9 }
 0x18b   : > { %2580 = vmatpush3.bf16.msra.mxu0 %v772_v9  ;;  %2838 = vmatpush3.bf16.msra.mxu1 %v772_v9 }
 0x18c   : > { %2581 = vmatprep.subr.bf16.mxu0 %v773_v10  ;;  %2831 = vmatprep.subr.bf16.mxu1 %v773_v10 }
 0x18f   : > { %2582 = vmatpush3.bf16.msra.mxu0 %v773_v10  ;;  %2839 = vmatpush3.bf16.msra.mxu1 %v773_v10 }
 0x190   : > { %2583 = vmatprep.subr.bf16.mxu0 %v774_v11  ;;  %2832 = vmatprep.subr.bf16.mxu1 %v774_v11 }
 0x193   : > { %2584 = vmatpush3.bf16.msra.mxu0 %v774_v11  ;;  %2840 = vmatpush3.bf16.msra.mxu1 %v774_v11 }
 0x196   : > { %2586 = vmatmul.mubr.bf16.vlgmr.msra.gmra.mrb[0].mxu0 %v2967_v12  ;;  %2594 = vmatmul.mubr.bf16.vlgmr.msra.gmra.mrb[0].mxu1 %v2968_v13 }
 0x197   : > { %2589 = vmatprep.mubr.bf16.mxu0 %v2969_v14  ;;  %2597 = vmatprep.mubr.bf16.mxu1 %v2970_v15 }
 0x19e   : > { %2590 = vmatmul.mubr.bf16.gmra.mrb[4].mxu0 %v2971_v16  ;;  %2598 = vmatmul.mubr.bf16.gmra.mrb[4].mxu1 %v2972_v17 }
 0x269   : > { %v2587_v22 = vpop.f32.mrb[0].mxu0  ;;  %v2595_v23 = vpop.f32.mrb[0].mxu1 }
 0x26a   : > { %v922_v26 = vadd.f32 %v2587_v22, %v733_v18  ;;  %v930_v27 = vadd.f32 %v2595_v23, %v741_v19  ;;  %v857_v28 = vpop.f32.mrb[1].mxu0  ;;  %v889_v29 = vpop.f32.mrb[1].mxu1 }
 0x26b   : > { %v920_v32 = vadd.f32 %v857_v28, %v731_v20  ;;  %v928_v33 = vadd.f32 %v889_v29, %v739_v21  ;;  %v2588_v34 = vpop.f32.mrb[2].mxu0  ;;  %v2596_v35 = vpop.f32.mrb[2].mxu1 }
 0x26c   : > { %938 = vst [vmem:[#allocation4 + $0x10] sm:$0xff] %v922_v26  ;;  %946 = vst [vmem:[#allocation4 + $0x50] sm:$0xff] %v930_v27  ;;  %v923_v36 = vadd.f32 %v2588_v34, %v734_v24  ;;  %v931_v37 = vadd.f32 %v2596_v35, %v742_v25  ;;  %v860_v38 = vpop.f32.mrb[3].mxu0  ;;  %v892_v39 = vpop.f32.mrb[3].mxu1 }
 0x26d   : > { %936 = vst [vmem:[#allocation4] sm:$0xff] %v920_v32  ;;  %944 = vst [vmem:[#allocation4 + $0x40] sm:$0xff] %v928_v33  ;;  %v921_v40 = vadd.f32 %v860_v38, %v732_v30  ;;  %v929_v41 = vadd.f32 %v892_v39, %v740_v31 }
 0x26e   : > { %939 = vst [vmem:[#allocation4 + $0x18] sm:$0xff] %v923_v36  ;;  %947 = vst [vmem:[#allocation4 + $0x58] sm:$0xff] %v931_v37 }
 0x26f   : > { %937 = vst [vmem:[#allocation4 + $0x8] sm:$0xff] %v921_v40  ;;  %945 = vst [vmem:[#allocation4 + $0x48] sm:$0xff] %v929_v41 }
 0x271   : > { %v2591_v46 = vpop.f32.mrb[4].mxu0  ;;  %v2599_v47 = vpop.f32.mrb[4].mxu1 }
 0x272   : > { %v926_v50 = vadd.f32 %v2591_v46, %v737_v42  ;;  %v934_v51 = vadd.f32 %v2599_v47, %v745_v43  ;;  %v873_v52 = vpop.f32.mrb[5].mxu0  ;;  %v905_v53 = vpop.f32.mrb[5].mxu1 }
 0x273   : > { %v924_v56 = vadd.f32 %v873_v52, %v735_v44  ;;  %v932_v57 = vadd.f32 %v905_v53, %v743_v45  ;;  %v2592_v58 = vpop.f32.mrb[6].mxu0  ;;  %v2600_v59 = vpop.f32.mrb[6].mxu1 }
 0x274   : > { %942 = vst [vmem:[#allocation4 + $0x30] sm:$0xff] %v926_v50  ;;  %950 = vst [vmem:[#allocation4 + $0x70] sm:$0xff] %v934_v51  ;;  %v927_v60 = vadd.f32 %v2592_v58, %v738_v48  ;;  %v935_v61 = vadd.f32 %v2600_v59, %v746_v49  ;;  %v876_v62 = vpop.f32.mrb[7].mxu0  ;;  %v908_v63 = vpop.f32.mrb[7].mxu1 }
 0x275   : > { %940 = vst [vmem:[#allocation4 + $0x20] sm:$0xff] %v924_v56  ;;  %948 = vst [vmem:[#allocation4 + $0x60] sm:$0xff] %v932_v57  ;;  %v925_v0 = vadd.f32 %v876_v62, %v736_v54  ;;  %v933_v1 = vadd.f32 %v908_v63, %v744_v55 }
 0x276   : > { %943 = vst [vmem:[#allocation4 + $0x38] sm:$0xff] %v927_v60  ;;  %951 = vst [vmem:[#allocation4 + $0x78] sm:$0xff] %v935_v61 }
 0x277   : > { %941 = vst [vmem:[#allocation4 + $0x28] sm:$0xff] %v925_v0  ;;  %949 = vst [vmem:[#allocation4 + $0x68] sm:$0xff] %v933_v1 }
 0x278 PF: > { %v974_v2 = vld [vmem:[%s3809_s4 + $0x10] sm:$0xff]  ;;  %v972_v3 = vld [vmem:[%s3809_s4] sm:$0xff]  ;;  %v3167_v4 = vmov 0   ;;  %v975_v5 = vld [vmem:[%s3809_s4 + $0x18] sm:$0xff] }
 0x279   : > { %2974 = vset.pattern.permute.xlu1 %v3167_v4  ;;  %2973 = vset.pattern.permute.xlu0 %v3167_v4  ;;  %v973_v6 = vld [vmem:[%s3809_s4 + $0x8] sm:$0xff]  ;;  %v976_v8 = vld [vmem:[%s3809_s4 + $0x20] sm:$0xff]  ;;  %v979_v9 = vld [vmem:[%s3809_s4 + $0x38] sm:$0xff] }
 0x27a   : > { %1000 = vperm.xlu1 %2974, %v974_v2   ;;  %990 = vperm.xlu0 %2973, %v972_v3   ;;  %v977_v7 = vld [vmem:[%s3809_s4 + $0x28] sm:$0xff]  ;;  %v978_v10 = vld [vmem:[%s3809_s4 + $0x30] sm:$0xff]  ;;  %v980_v12 = vld [vmem:[%s3809_s4 + $0x40] sm:$0xff] }
 0x27b   : > { %v981_v11 = vld [vmem:[%s3809_s4 + $0x48] sm:$0xff]  ;;  %v983_v13 = vld [vmem:[%s3809_s4 + $0x58] sm:$0xff]  ;;  %v982_v14 = vld [vmem:[%s3809_s4 + $0x50] sm:$0xff] }
 0x27c   : > { %v985_v15 = vld [vmem:[%s3809_s4 + $0x68] sm:$0xff]  ;;  %v984_v16 = vld [vmem:[%s3809_s4 + $0x60] sm:$0xff]  ;;  %v987_v17 = vld [vmem:[%s3809_s4 + $0x78] sm:$0xff] }
 0x27d   : > { %v986_v18 = vld [vmem:[%s3809_s4 + $0x70] sm:$0xff]  ;;  %v3457_v21 = vld [vmem:[%s3368_s13 + $0x8] sm:$0xf]  ;;  %v3460_v22 = vld [vmem:[%s3368_s13 + $0xc] sm:$0xf] }
 0x27e   : > { %1005 = vperm.xlu1 %2974, %v975_v5   ;;  %995 = vperm.xlu0 %2973, %v973_v6   ;;  %v3451_v19 = vld [vmem:[%s3368_s13] sm:$0xf]  ;;  %v3454_v20 = vld [vmem:[%s3368_s13 + $0x4] sm:$0xf]  ;;  %v3463_v23 = vld [vmem:[%s3368_s13 + $0x10] sm:$0xf] }
 0x27f   : > { %v3466_v24 = vld [vmem:[%s3368_s13 + $0x14] sm:$0xf]  ;;  %v3469_v25 = vld [vmem:[%s3368_s13 + $0x18] sm:$0xf]  ;;  %v3472_v26 = vld [vmem:[%s3368_s13 + $0x1c] sm:$0xf] }
 0x280   : > { %v3475_v27 = vld [vmem:[%s3368_s13 + $0x20] sm:$0xf]  ;;  %v3478_v28 = vld [vmem:[%s3368_s13 + $0x24] sm:$0xf]  ;;  %v3481_v29 = vld [vmem:[%s3368_s13 + $0x28] sm:$0xf] }
 0x281   : > { %v3484_v30 = vld [vmem:[%s3368_s13 + $0x2c] sm:$0xf]  ;;  %v3487_v31 = vld [vmem:[%s3368_s13 + $0x30] sm:$0xf]  ;;  %v3490_v32 = vld [vmem:[%s3368_s13 + $0x34] sm:$0xf] }
 0x282   : > { %1015 = vperm.xlu1 %2974, %v977_v7   ;;  %1010 = vperm.xlu0 %2973, %v976_v8   ;;  %v3493_v33 = vld [vmem:[%s3368_s13 + $0x38] sm:$0xf]  ;;  %v3496_v34 = vld [vmem:[%s3368_s13 + $0x3c] sm:$0xf]  ;;  %v3499_v35 = vld [vmem:[%s3368_s13 + $0x40] sm:$0xf] }
 0x283   : > { %v3502_v36 = vld [vmem:[%s3368_s13 + $0x44] sm:$0xf]  ;;  %v3505_v37 = vld [vmem:[%s3368_s13 + $0x48] sm:$0xf]  ;;  %v3508_v38 = vld [vmem:[%s3368_s13 + $0x4c] sm:$0xf] }
 0x284   : > { %v3511_v39 = vld [vmem:[%s3368_s13 + $0x50] sm:$0xf]  ;;  %v3514_v40 = vld [vmem:[%s3368_s13 + $0x54] sm:$0xf]  ;;  %v3517_v41 = vld [vmem:[%s3368_s13 + $0x58] sm:$0xf] }
 0x285   : > { %v3520_v42 = vld [vmem:[%s3368_s13 + $0x5c] sm:$0xf]  ;;  %v3523_v43 = vld [vmem:[%s3368_s13 + $0x60] sm:$0xf]  ;;  %v3526_v44 = vld [vmem:[%s3368_s13 + $0x64] sm:$0xf] }
 0x286   : > { %1025 = vperm.xlu1 %2974, %v979_v9   ;;  %1020 = vperm.xlu0 %2973, %v978_v10   ;;  %v3529_v45 = vld [vmem:[%s3368_s13 + $0x68] sm:$0xf]  ;;  %v3532_v46 = vld [vmem:[%s3368_s13 + $0x6c] sm:$0xf]  ;;  %v3535_v47 = vld [vmem:[%s3368_s13 + $0x70] sm:$0xf] }
 0x287   : > { %v3538_v48 = vld [vmem:[%s3368_s13 + $0x74] sm:$0xf]  ;;  %v3541_v49 = vld [vmem:[%s3368_s13 + $0x78] sm:$0xf]  ;;  %v3544_v50 = vld [vmem:[%s3368_s13 + $0x7c] sm:$0xf] }
 0x288   : > { %v3551_v51 = vld [vmem:[%s441_s24] sm:$0x1]  ;;  %v958_v54 = vld [vmem:[#allocation4 + $0x10] sm:$0xff]  ;;  %v959_v56 = vld [vmem:[#allocation4 + $0x18] sm:$0xff] }
 0x289   : > { %3835 = vst [vmem:[#allocation22_spill] sm:$0xff] %v3551_v51  ;;  %v956_v55 = vld [vmem:[#allocation4] sm:$0xff]  ;;  %v957_v57 = vld [vmem:[#allocation4 + $0x8] sm:$0xff]  ;;  %v963_v8 = vld [vmem:[#allocation4 + $0x38] sm:$0xff] }
 0x28a   : > { %1035 = vperm.xlu1 %2974, %v981_v11   ;;  %1030 = vperm.xlu0 %2973, %v980_v12   ;;  %v961_v0 = vld [vmem:[#allocation4 + $0x28] sm:$0xff]  ;;  %v960_v1 = vld [vmem:[#allocation4 + $0x20] sm:$0xff]  ;;  %v962_v9 = vld [vmem:[#allocation4 + $0x30] sm:$0xff] }
 0x28e   : > { %1045 = vperm.xlu1 %2974, %v983_v13   ;;  %1040 = vperm.xlu0 %2973, %v982_v14  }
 0x292   : > { %1055 = vperm.xlu1 %2974, %v985_v15   ;;  %1050 = vperm.xlu0 %2973, %v984_v16   ;;  %v965_v15 = vld [vmem:[#allocation4 + $0x48] sm:$0xff]  ;;  %v964_v16 = vld [vmem:[#allocation4 + $0x40] sm:$0xff] }
 0x296   : > { %1065 = vperm.xlu1 %2974, %v987_v17   ;;  %1060 = vperm.xlu0 %2973, %v986_v18  }
 0x2f9   : > { %v1001_v52 = vpop.permute.xlu1 %1000  ;;  %v991_v53 = vpop.permute.xlu0 %990 }
 0x2fa   : > { %v1070_v60 = vmul.f32 %v1001_v52, %v958_v54  ;;  %v1068_v61 = vmul.f32 %v991_v53, %v956_v55  ;;  %v967_v55 = vld [vmem:[#allocation4 + $0x58] sm:$0xff] }
 0x2fd   : > { %v1006_v58 = vpop.permute.xlu1 %1005  ;;  %v996_v59 = vpop.permute.xlu0 %995 }
 0x2fe   : > { %v1071_v62 = vmul.f32 %v1006_v58, %v959_v56  ;;  %v1069_v63 = vmul.f32 %v996_v59, %v957_v57  ;;  %v966_v56 = vld [vmem:[#allocation4 + $0x50] sm:$0xff] }
 0x300   : > { %v3553_v2 = vpack.c.bf16 %v1071_v62, %v1070_v60  ;;  %v3555_v3 = vpack.c.bf16 %v1069_v63, %v1068_v61  ;;  %v969_v62 = vld [vmem:[#allocation4 + $0x68] sm:$0xff]  ;;  %v968_v63 = vld [vmem:[#allocation4 + $0x60] sm:$0xff] }
 0x301   : > { %v1016_v4 = vpop.permute.xlu1 %1015  ;;  %v1011_v5 = vpop.permute.xlu0 %1010 }
 0x302   : > { %v1073_v6 = vmul.f32 %v1016_v4, %v961_v0  ;;  %v1072_v7 = vmul.f32 %v1011_v5, %v960_v1  ;;  %2649 = vmatprep.mubr.bf16.mxu0 (!%p2327_p3), %v3555_v3 }
 0x304   : > { %v3557_v10 = vpack.c.bf16 %v1073_v6, %v1072_v7  ;;  %v971_v7 = vld [vmem:[#allocation4 + $0x78] sm:$0xff] }
 0x305   : > { %v1026_v11 = vpop.permute.xlu1 %1025  ;;  %v1021_v12 = vpop.permute.xlu0 %1020 }
 0x306   : > { %v1075_v13 = vmul.f32 %v1026_v11, %v963_v8  ;;  %v1074_v14 = vmul.f32 %v1021_v12, %v962_v9  ;;  %v970_v8 = vld [vmem:[#allocation4 + $0x70] sm:$0xff] }
 0x308   : > { %v3559_v17 = vpack.c.bf16 %v1075_v13, %v1074_v14 }
 0x309   : > { %v1036_v18 = vpop.permute.xlu1 %1035  ;;  %v1031_v52 = vpop.permute.xlu0 %1030 }
 0x30a   : > { %v1077_v53 = vmul.f32 %v1036_v18, %v965_v15  ;;  %v1076_v54 = vmul.f32 %v1031_v52, %v964_v16  ;;  %v2346_v16 = vcombine.low (!%p2327_p3), %v3499_v35, %v3502_v36  ;;  %v2354_v18 = vcombine.low (!%p2327_p3), %v3451_v19, %v3454_v20 }
 0x30b   : > { %v2347_v52 = vcombine.low (!%p2327_p3), %v3505_v37, %v3508_v38 }
 0x30c   : > { %v3561_v57 = vpack.c.bf16 %v1077_v53, %v1076_v54  ;;  %v2355_v53 = vcombine.low (!%p2327_p3), %v3457_v21, %v3460_v22  ;;  %v1132_v54 = vld [vmem:[#allocation2] sm:$0xff] (!%p2327_p3)  ;;  %2601 = vmatprep.subr.bf16.mxu1 (!%p2327_p3), %v2346_v16  ;;  %2633 = vmatprep.subr.bf16.mxu0 (!%p2327_p3), %v2354_v18 }
 0x30d   : > { %v1046_v58 = vpop.permute.xlu1 %1045  ;;  %v1041_v59 = vpop.permute.xlu0 %1040  ;;  %2617 = vmatprep.mubr.bf16.mxu1 (!%p2327_p3), %v1132_v54  ;;  %2602 = vmatpush3.bf16.msra.mxu1 (!%p2327_p3), %v2346_v16  ;;  %v1139_v16 = vld [vmem:[#allocation2 + $0x38] sm:$0xff] (!%p2327_p3) }
 0x30e   : > { %v1079_v60 = vmul.f32 %v1046_v58, %v967_v55  ;;  %v1078_v61 = vmul.f32 %v1041_v59, %v966_v56  ;;  %2634 = vmatpush3.bf16.msra.mxu0 (!%p2327_p3), %v2354_v18  ;;  %2603 = vmatprep.subr.bf16.mxu1 (!%p2327_p3), %v2347_v52  ;;  %v2348_v55 = vcombine.low (!%p2327_p3), %v3511_v39, %v3514_v40  ;;  %v1431_v18 = vlaneseq (!%p2327_p3) }
 0x30f   : > { %2635 = vmatprep.subr.bf16.mxu0 (!%p2327_p3), %v2355_v53  ;;  %v2356_v56 = vcombine.low (!%p2327_p3), %v3463_v23, %v3466_v24  ;;  %v2349_v58 = vcombine.low (!%p2327_p3), %v3517_v41, %v3520_v42  ;;  %v2357_v59 = vcombine.low (!%p2327_p3), %v3469_v25, %v3472_v26 }
 0x310   : > { %v3563_v0 = vpack.c.bf16 %v1079_v60, %v1078_v61  ;;  %v2350_v60 = vcombine.low (!%p2327_p3), %v3523_v43, %v3526_v44  ;;  %v2358_v61 = vcombine.low (!%p2327_p3), %v3475_v27, %v3478_v28 }
 0x311   : > { %v1056_v1 = vpop.permute.xlu1 %1055  ;;  %v1051_v4 = vpop.permute.xlu0 %1050  ;;  %2604 = vmatpush3.bf16.msra.mxu1 (!%p2327_p3), %v2347_v52  ;;  %v1432_v52 = vshrl.u32 (!%p2327_p3), %v1431_v18, 7 }
 0x312   : > { %v1081_v5 = vmul.f32 %v1056_v1, %v969_v62  ;;  %v1080_v6 = vmul.f32 %v1051_v4, %v968_v63  ;;  %1127 = sbr.rel (%p2327_p3) target bundleno = 1061 (0x425), region = 92  ;;  %2636 = vmatpush3.bf16.msra.mxu0 (!%p2327_p3), %v2355_v53  ;;  %2605 = vmatprep.subr.bf16.mxu1 (!%p2327_p3), %v2348_v55  ;;  %v2351_v62 = vcombine.low (!%p2327_p3), %v3529_v45, %v3532_v46 }
 0x313   : > { %2637 = vmatprep.subr.bf16.mxu0 (!%p2327_p3), %v2356_v56  ;;  %v2359_v63 = vcombine.low (!%p2327_p3), %v3481_v29, %v3484_v30  ;;  %v2352_v1 = vcombine.low (!%p2327_p3), %v3535_v47, %v3538_v48  ;;  %v2360_v4 = vcombine.low (!%p2327_p3), %v3487_v31, %v3490_v32  ;;  %v1433_v53 = vsub.s32 (!%p2327_p3), 0, %v1432_v52 }
 0x314   : > { %v3565_v9 = vpack.c.bf16 %v1081_v5, %v1080_v6  ;;  %v2353_v5 = vcombine.low (!%p2327_p3), %v3541_v49, %v3544_v50  ;;  %v2361_v6 = vcombine.low (!%p2327_p3), %v3493_v33, %v3496_v34 }
 0x315   : > { %v1066_v11 = vpop.permute.xlu1 %1065  ;;  %v1061_v12 = vpop.permute.xlu0 %1060  ;;  %2606 = vmatpush3.bf16.msra.mxu1 (!%p2327_p3), %v2348_v55  ;;  %v3612_v54 = vrot.slane (!%p2327_p3), %v3551_v51, %v1433_v53 }
 0x316   : > { %v1083_v13 = vmul.f32 %v1066_v11, %v971_v7  ;;  %v1082_v14 = vmul.f32 %v1061_v12, %v970_v8  ;;  %2638 = vmatpush3.bf16.msra.mxu0 (!%p2327_p3), %v2356_v56  ;;  %2607 = vmatprep.subr.bf16.mxu1 (!%p2327_p3), %v2349_v58  ;;  %v1133_v7 = vld [vmem:[#allocation2 + $0x8] sm:$0xff] (!%p2327_p3)  ;;  %v1134_v8 = vld [vmem:[#allocation2 + $0x10] sm:$0xff] (!%p2327_p3)  ;;  %v1135_v11 = vld [vmem:[#allocation2 + $0x18] sm:$0xff] (!%p2327_p3) }
 0x317   : > { %2639 = vmatprep.subr.bf16.mxu0 (!%p2327_p3), %v2357_v59  ;;  %v1136_v12 = vld [vmem:[#allocation2 + $0x20] sm:$0xff] (!%p2327_p3) }
 0x318   : > { %v3567_v15 = vpack.c.bf16 %v1083_v13, %v1082_v14  ;;  %v1137_v13 = vld [vmem:[#allocation2 + $0x28] sm:$0xff] (!%p2327_p3)  ;;  %v1138_v14 = vld [vmem:[#allocation2 + $0x30] sm:$0xff] (!%p2327_p3) }
 0x319   : > { %2608 = vmatpush3.bf16.msra.mxu1 %v2349_v58 }
 0x31a   : > { %2640 = vmatpush3.bf16.msra.mxu0 %v2357_v59  ;;  %2609 = vmatprep.subr.bf16.mxu1 %v2350_v60 }
 0x31b   : > { %2641 = vmatprep.subr.bf16.mxu0 %v2358_v61 }
 0x31d   : > { %2610 = vmatpush3.bf16.msra.mxu1 %v2350_v60 }
 0x31e   : > { %2642 = vmatpush3.bf16.msra.mxu0 %v2358_v61  ;;  %2611 = vmatprep.subr.bf16.mxu1 %v2351_v62 }
 0x31f   : > { %2643 = vmatprep.subr.bf16.mxu0 %v2359_v63 }
 0x321   : > { %2612 = vmatpush3.bf16.msra.mxu1 %v2351_v62 }
 0x322   : > { %2644 = vmatpush3.bf16.msra.mxu0 %v2359_v63  ;;  %2613 = vmatprep.subr.bf16.mxu1 %v2352_v1 }
 0x323   : > { %2645 = vmatprep.subr.bf16.mxu0 %v2360_v4 }
 0x325   : > { %2614 = vmatpush3.bf16.msra.mxu1 %v2352_v1 }
 0x326   : > { %2646 = vmatpush3.bf16.msra.mxu0 %v2360_v4  ;;  %2615 = vmatprep.subr.bf16.mxu1 %v2353_v5 }
 0x327   : > { %2647 = vmatprep.subr.bf16.mxu0 %v2361_v6 }
 0x329   : > { %2616 = vmatpush3.bf16.msra.mxu1 %v2353_v5 }
 0x32a   : > { %2648 = vmatpush3.bf16.msra.mxu0 %v2361_v6 }
 0x32c   : > { %2618 = vmatmul.mubr.bf16.vlgmr.msra.gmra.mrb[0].mxu1 %v1133_v7 }
 0x32d   : > { %2650 = vmatmul.mubr.bf16.vlgmr.msra.gmra.mrb[0].mxu0 %v3553_v2  ;;  %2621 = vmatprep.mubr.bf16.mxu1 %v1134_v8 }
 0x32e   : > { %2653 = vmatprep.mubr.bf16.mxu0 %v3557_v10 }
 0x334   : > { %2622 = vmatmul.mubr.bf16.gmra.mrb[4].mxu1 %v1135_v11 }
 0x335   : > { %2654 = vmatmul.mubr.bf16.gmra.mrb[4].mxu0 %v3559_v17  ;;  %2625 = vmatprep.mubr.bf16.mxu1 %v1136_v12 }
 0x336   : > { %2657 = vmatprep.mubr.bf16.mxu0 %v3561_v57 }
 0x33c   : > { %2626 = vmatmul.mubr.bf16.gmra.mrb[8].mxu1 %v1137_v13 }
 0x33d   : > { %2658 = vmatmul.mubr.bf16.gmra.mrb[8].mxu0 %v3563_v0  ;;  %2629 = vmatprep.mubr.bf16.mxu1 %v1138_v14 }
 0x33e   : > { %2661 = vmatprep.mubr.bf16.mxu0 %v3565_v9 }
 0x344   : > { %2630 = vmatmul.mubr.bf16.gmra.mrb[12].mxu1 %v1139_v16 }
 0x345   : > { %2662 = vmatmul.mubr.bf16.gmra.mrb[12].mxu0 %v3567_v15 }
 0x3ff   : > { %v2619_v55 = vpop.f32.mrb[0].mxu1 }
 0x400   : > { %v2651_v56 = vpop.f32.mrb[0].mxu0  ;;  %v1222_v59 = vpop.f32.mrb[1].mxu1 }
 0x401   : > { %v1376_v58 = vadd.f32 %v2651_v56, %v2619_v55  ;;  %v1367_v60 = vpop.f32.mrb[1].mxu0  ;;  %v2620_v62 = vpop.f32.mrb[2].mxu1 }
 0x402   : > { %v1368_v61 = vadd.f32 %v1367_v60, %v1222_v59  ;;  %v2652_v63 = vpop.f32.mrb[2].mxu0  ;;  %v1225_v5 = vpop.f32.mrb[3].mxu1 }
 0x403   : > { %v1438_v1 = vadd.f32 %v3612_v54, %v1376_v58  ;;  %v1379_v4 = vadd.f32 %v2652_v63, %v2620_v62  ;;  %v1370_v6 = vpop.f32.mrb[3].mxu0 }
 0x404   : > { %v1436_v7 = vadd.f32 %v3612_v54, %v1368_v61  ;;  %v1371_v8 = vadd.f32 %v1370_v6, %v1225_v5 }
 0x405   : > { %v1439_v11 = vadd.f32 %v3612_v54, %v1379_v4  ;;  %v1454_v13 = vmax.f32 %v1438_v1, 0.0 }
 0x406   : > { %v1437_v12 = vadd.f32 %v3612_v54, %v1371_v8  ;;  %v1452_v16 = vmax.f32 %v1436_v7, 0.0 }
 0x407   : > { %v1455_v14 = vmax.f32 %v1439_v11, 0.0  ;;  %v2623_v52 = vpop.f32.mrb[4].mxu1 }
 0x408   : > { %v1453_v18 = vmax.f32 %v1437_v12, 0.0  ;;  %v2655_v53 = vpop.f32.mrb[4].mxu0  ;;  %v1238_v59 = vpop.f32.mrb[5].mxu1 }
 0x409   : > { %v1469_v55 = vpack.c.bf16 %v1455_v14, %v1454_v13  ;;  %v1392_v56 = vadd.f32 %v2655_v53, %v2623_v52  ;;  %v1383_v58 = vpop.f32.mrb[5].mxu0  ;;  %v2624_v63 = vpop.f32.mrb[6].mxu1 }
 0x40a   : > { %v1468_v60 = vpack.c.bf16 %v1453_v18, %v1452_v16  ;;  %v1384_v62 = vadd.f32 %v1383_v58, %v1238_v59  ;;  %v2656_v51 = vpop.f32.mrb[6].mxu0  ;;  %v1241_v5 = vpop.f32.mrb[7].mxu1 }
 0x40b   : > { %1479 = vst [vmem:[#allocation3 + $0x8] sm:$0xff] %v1469_v55  ;;  %v1442_v61 = vadd.f32 %v3612_v54, %v1392_v56  ;;  %v1395_v4 = vadd.f32 %v2656_v51, %v2624_v63  ;;  %v1386_v6 = vpop.f32.mrb[7].mxu0 }
 0x40c   : > { %1478 = vst [vmem:[#allocation3] sm:$0xff] %v1468_v60  ;;  %v1440_v1 = vadd.f32 %v3612_v54, %v1384_v62  ;;  %v1387_v7 = vadd.f32 %v1386_v6, %v1241_v5 }
 0x40d   : > { %v1443_v8 = vadd.f32 %v3612_v54, %v1395_v4  ;;  %v1458_v12 = vmax.f32 %v1442_v61, 0.0 }
 0x40e   : > { %v1441_v11 = vadd.f32 %v3612_v54, %v1387_v7  ;;  %v1456_v14 = vmax.f32 %v1440_v1, 0.0 }
 0x40f   : > { %v1459_v13 = vmax.f32 %v1443_v8, 0.0  ;;  %v2627_v18 = vpop.f32.mrb[8].mxu1 }
 0x410   : > { %v1457_v16 = vmax.f32 %v1441_v11, 0.0  ;;  %v2659_v52 = vpop.f32.mrb[8].mxu0  ;;  %v1254_v56 = vpop.f32.mrb[9].mxu1 }
 0x411   : > { %v1471_v53 = vpack.c.bf16 %v1459_v13, %v1458_v12  ;;  %v1408_v55 = vadd.f32 %v2659_v52, %v2627_v18  ;;  %v1399_v51 = vpop.f32.mrb[9].mxu0  ;;  %v2628_v60 = vpop.f32.mrb[10].mxu1 }
 0x412   : > { %v1470_v59 = vpack.c.bf16 %v1457_v16, %v1456_v14  ;;  %v1400_v58 = vadd.f32 %v1399_v51, %v1254_v56  ;;  %v2660_v63 = vpop.f32.mrb[10].mxu0  ;;  %v1257_v5 = vpop.f32.mrb[11].mxu1 }
 0x413   : > { %1481 = vst [vmem:[#allocation3 + $0x18] sm:$0xff] %v1471_v53  ;;  %v1446_v62 = vadd.f32 %v3612_v54, %v1408_v55  ;;  %v1411_v4 = vadd.f32 %v2660_v63, %v2628_v60  ;;  %v1402_v6 = vpop.f32.mrb[11].mxu0 }
 0x414   : > { %1480 = vst [vmem:[#allocation3 + $0x10] sm:$0xff] %v1470_v59  ;;  %v1444_v61 = vadd.f32 %v3612_v54, %v1400_v58  ;;  %v1403_v1 = vadd.f32 %v1402_v6, %v1257_v5 }
 0x415   : > { %v1447_v7 = vadd.f32 %v3612_v54, %v1411_v4  ;;  %v1462_v11 = vmax.f32 %v1446_v62, 0.0 }
 0x416   : > { %v1445_v8 = vadd.f32 %v3612_v54, %v1403_v1  ;;  %v1460_v13 = vmax.f32 %v1444_v61, 0.0 }
 0x417   : > { %v1463_v12 = vmax.f32 %v1447_v7, 0.0  ;;  %v2631_v16 = vpop.f32.mrb[12].mxu1 }
 0x418   : > { %v1461_v14 = vmax.f32 %v1445_v8, 0.0  ;;  %v2663_v18 = vpop.f32.mrb[12].mxu0  ;;  %v1270_v55 = vpop.f32.mrb[13].mxu1 }
 0x419   : > { %v1473_v52 = vpack.c.bf16 %v1463_v12, %v1462_v11  ;;  %v1424_v53 = vadd.f32 %v2663_v18, %v2631_v16  ;;  %v1415_v56 = vpop.f32.mrb[13].mxu0  ;;  %v2632_v59 = vpop.f32.mrb[14].mxu1 }
 0x41a   : > { %v1472_v51 = vpack.c.bf16 %v1461_v14, %v1460_v13  ;;  %v1416_v60 = vadd.f32 %v1415_v56, %v1270_v55  ;;  %v2664_v63 = vpop.f32.mrb[14].mxu0  ;;  %v1273_v5 = vpop.f32.mrb[15].mxu1 }
 0x41b   : > { %1483 = vst [vmem:[#allocation3 + $0x28] sm:$0xff] %v1473_v52  ;;  %v1450_v58 = vadd.f32 %v3612_v54, %v1424_v53  ;;  %v1427_v4 = vadd.f32 %v2664_v63, %v2632_v59  ;;  %v1418_v6 = vpop.f32.mrb[15].mxu0 }
 0x41c   : > { %1482 = vst [vmem:[#allocation3 + $0x20] sm:$0xff] %v1472_v51  ;;  %v1448_v62 = vadd.f32 %v3612_v54, %v1416_v60  ;;  %v1419_v61 = vadd.f32 %v1418_v6, %v1273_v5 }
 0x41d   : > { %v1451_v1 = vadd.f32 %v3612_v54, %v1427_v4  ;;  %v1466_v8 = vmax.f32 %v1450_v58, 0.0 }
 0x41e   : > { %v1449_v7 = vadd.f32 %v3612_v54, %v1419_v61  ;;  %v1464_v12 = vmax.f32 %v1448_v62, 0.0 }
 0x41f   : > { %v1467_v11 = vmax.f32 %v1451_v1, 0.0 }
 0x420   : > { %v1465_v13 = vmax.f32 %v1449_v7, 0.0 }
 0x421   : > { %v1475_v14 = vpack.c.bf16 %v1467_v11, %v1466_v8 }
 0x422   : > { %v1474_v16 = vpack.c.bf16 %v1465_v13, %v1464_v12 }
 0x423   : > { %1485 = vst [vmem:[#allocation3 + $0x38] sm:$0xff] %v1475_v14 }
 0x424   : > { %1484 = vst [vmem:[#allocation3 + $0x30] sm:$0xff] %v1474_v16 }
 0x425 PF: > { %1488 = sbr.rel (%p2336_p0) target bundleno = 1626 (0x65a), region = 96  ;;  %v2363_v18 = vcombine.low (!%p2336_p0), %v3499_v35, %v3502_v36  ;;  %v2364_v52 = vcombine.low (!%p2336_p0), %v3505_v37, %v3508_v38  ;;  %v1493_v53 = vld [vmem:[#allocation3] sm:$0xff] (!%p2336_p0)  ;;  %v2365_v54 = vcombine.low (!%p2336_p0), %v3511_v39, %v3514_v40  ;;  %v2366_v55 = vcombine.low (!%p2336_p0), %v3517_v41, %v3520_v42  ;;  %v1494_v40 = vld [vmem:[#allocation3 + $0x8] sm:$0xff] (!%p2336_p0)  ;;  %v1495_v42 = vld [vmem:[#allocation3 + $0x10] sm:$0xff] (!%p2336_p0) }
 0x426   : > { %2681 = vmatprep.mubr.bf16.mxu0 (!%p2336_p0), %v1493_v53  ;;  %v2367_v35 = vcombine.low (!%p2336_p0), %v3523_v43, %v3526_v44  ;;  %v2368_v36 = vcombine.low (!%p2336_p0), %v3529_v45, %v3532_v46  ;;  %v2369_v37 = vcombine.low (!%p2336_p0), %v3535_v47, %v3538_v48  ;;  %v2370_v38 = vcombine.low (!%p2336_p0), %v3541_v49, %v3544_v50  ;;  %v1496_v44 = vld [vmem:[#allocation3 + $0x18] sm:$0xff] (!%p2336_p0) }
 0x427   : > { %2665 = vmatprep.subr.bf16.mxu0 (!%p2336_p0), %v2363_v18  ;;  %v2371_v39 = vcombine.low (!%p2336_p0), %v3451_v19, %v3454_v20  ;;  %v2372_v41 = vcombine.low (!%p2336_p0), %v3457_v21, %v3460_v22  ;;  %v2373_v43 = vcombine.low (!%p2336_p0), %v3463_v23, %v3466_v24  ;;  %v2374_v19 = vcombine.low (!%p2336_p0), %v3469_v25, %v3472_v26  ;;  %v1497_v20 = vld [vmem:[#allocation3 + $0x20] sm:$0xff] (!%p2336_p0)  ;;  %v1498_v22 = vld [vmem:[#allocation3 + $0x28] sm:$0xff] (!%p2336_p0) }
 0x428   : > { %2666 = vmatpush3.bf16.msra.mxu0 (!%p2336_p0), %v2363_v18  ;;  %v2375_v21 = vcombine.low (!%p2336_p0), %v3475_v27, %v3478_v28  ;;  %v2376_v23 = vcombine.low (!%p2336_p0), %v3481_v29, %v3484_v30  ;;  %v2377_v25 = vcombine.low (!%p2336_p0), %v3487_v31, %v3490_v32  ;;  %v2378_v27 = vcombine.low (!%p2336_p0), %v3493_v33, %v3496_v34  ;;  %v3836_v32 = vld [vmem:[#allocation22_spill] sm:$0xff] (!%p2336_p0) }
 0x429   : > { %2667 = vmatprep.subr.bf16.mxu0 (!%p2336_p0), %v2364_v52  ;;  %v3168_v28 = vmov (!%p2336_p0), 0.0   ;;  %vm3169_vm0 = vmmov (!%p2336_p0), 0   ;;  %v1792_v29 = vlaneseq (!%p2336_p0) }
 0x42a   : > { %v1500_v26 = vld [vmem:[#allocation3 + $0x38] sm:$0xff] (!%p2336_p0)  ;;  %2729 = vmatprep.subr.bf16.mxu1 (!%p2336_p0), %v3168_v28  ;;  %2745 = vmatprep.mubr.msk.bf16.mxu1 (!%p2336_p0), %vm3169_vm0, %v3168_v28 }
 0x42b   : > { %v1499_v24 = vld [vmem:[#allocation3 + $0x30] sm:$0xff] (!%p2336_p0)  ;;  %v1793_v30 = vshrl.u32 (!%p2336_p0), %v1792_v29, 7  ;;  %v1837_v29 = vld [vmem:[#allocation5] sm:$0xff] (!%p2336_p0) }
 0x42c   : > { %2668 = vmatpush3.bf16.msra.mxu0 %v2364_v52 }
 0x42d   : > { %2669 = vmatprep.subr.bf16.mxu0 %v2365_v54  ;;  %v1794_v31 = vsub.s32 0, %v1793_v30 }
 0x42f   : > { %v1795_v33 = vrot.slane %v3836_v32, %v1794_v31 }
 0x430   : > { %2670 = vmatpush3.bf16.msra.mxu0 %v2365_v54 }
 0x431   : > { %2671 = vmatprep.subr.bf16.mxu0 %v2366_v55 }
 0x434   : > { %2672 = vmatpush3.bf16.msra.mxu0 %v2366_v55 }
 0x435   : > { %2673 = vmatprep.subr.bf16.mxu0 %v2367_v35 }
 0x438   : > { %2674 = vmatpush3.bf16.msra.mxu0 %v2367_v35 }
 0x439   : > { %2675 = vmatprep.subr.bf16.mxu0 %v2368_v36 }
 0x43c   : > { %2676 = vmatpush3.bf16.msra.mxu0 %v2368_v36 }
 0x43d   : > { %2677 = vmatprep.subr.bf16.mxu0 %v2369_v37 }
 0x440   : > { %2678 = vmatpush3.bf16.msra.mxu0 %v2369_v37 }
 0x441   : > { %2679 = vmatprep.subr.bf16.mxu0 %v2370_v38 }
 0x444   : > { %2680 = vmatpush3.bf16.msra.mxu0 %v2370_v38 }
 0x445   : > { %2697 = vmatprep.subr.bf16.mxu0 %v2371_v39 }
 0x447   : > { %2682 = vmatmul.mubr.bf16.vlgmr.msra.gmra.mrb[0].mxu0 %v1494_v40 }
 0x448   : > { %2698 = vmatpush3.bf16.msra.mxu0 %v2371_v39  ;;  %2685 = vmatprep.mubr.bf16.mxu0 %v1495_v42 }
 0x449   : > { %2699 = vmatprep.subr.bf16.mxu0 %v2372_v41 }
 0x44c   : > { %2700 = vmatpush3.bf16.msra.mxu0 %v2372_v41 }
 0x44d   : > { %2701 = vmatprep.subr.bf16.mxu0 %v2373_v43 }
 0x44f   : > { %2686 = vmatmul.mubr.bf16.gmra.mrb[4].mxu0 %v1496_v44 }
 0x450   : > { %2702 = vmatpush3.bf16.msra.mxu0 %v2373_v43  ;;  %2689 = vmatprep.mubr.bf16.mxu0 %v1497_v20 }
 0x451   : > { %2703 = vmatprep.subr.bf16.mxu0 %v2374_v19 }
 0x454   : > { %2704 = vmatpush3.bf16.msra.mxu0 %v2374_v19 }
 0x455   : > { %2705 = vmatprep.subr.bf16.mxu0 %v2375_v21 }
 0x457   : > { %2690 = vmatmul.mubr.bf16.gmra.mrb[8].mxu0 %v1498_v22 }
 0x458   : > { %2706 = vmatpush3.bf16.msra.mxu0 %v2375_v21  ;;  %2693 = vmatprep.mubr.bf16.mxu0 %v1499_v24 }
 0x459   : > { %2707 = vmatprep.subr.bf16.mxu0 %v2376_v23 }
 0x45c   : > { %2708 = vmatpush3.bf16.msra.mxu0 %v2376_v23 }
 0x45d   : > { %2709 = vmatprep.subr.bf16.mxu0 %v2377_v25 }
 0x45f   : > { %2694 = vmatmul.mubr.bf16.gmra.mrb[12].mxu0 %v1500_v26  ;;  %v1838_v26 = vld [vmem:[%s3810_s5] sm:$0xf] }
 0x460   : > { %2710 = vmatpush3.bf16.msra.mxu0 %v2377_v25  ;;  %2713 = vmatprep.mubr.bf16.mxu0 %v3555_v3 }
 0x461   : > { %2711 = vmatprep.subr.bf16.mxu0 %v2378_v27 }
 0x464   : > { %2712 = vmatpush3.bf16.msra.mxu0 %v2378_v27  ;;  %v1882_v27 = vld [vmem:[%s3811_s6] sm:$0xf] }
 0x467   : > { %2714 = vmatmul.mubr.bf16.vlgmr.msra.gmra.mrb[0].mxu0 %v3553_v2 }
 0x468   : > { %2717 = vmatprep.mubr.bf16.mxu0 %v3557_v10 }
 0x46f   : > { %2718 = vmatmul.mubr.bf16.gmra.mrb[4].mxu0 %v3559_v17 }
 0x470   : > { %2721 = vmatprep.mubr.bf16.mxu0 %v3561_v57 }
 0x477   : > { %2722 = vmatmul.mubr.bf16.gmra.mrb[8].mxu0 %v3563_v0 }
 0x478   : > { %2725 = vmatprep.mubr.bf16.mxu0 %v3565_v9 }
 0x47f   : > { %2726 = vmatmul.mubr.bf16.gmra.mrb[12].mxu0 %v3567_v15 }
 0x53a   : > { %v2715_v34 = vpop.f32.mrb[0].mxu0 }
 0x53b   : > { %v1799_v45 = vadd.f32 %v2715_v34, %v1795_v33  ;;  %v1728_v46 = vpop.f32.mrb[1].mxu0 }
 0x53c   : > { %v1797_v47 = vadd.f32 %v1795_v33, %v1728_v46  ;;  %v2716_v48 = vpop.f32.mrb[2].mxu0 }
 0x53d   : > { %v1800_v49 = vadd.f32 %v2716_v48, %v1795_v33  ;;  %v1731_v50 = vpop.f32.mrb[3].mxu0  ;;  %v1815_v3 = vmax.f32 %v1799_v45, 0.0  ;;  %v1881_v45 = vld [vmem:[#allocation6] sm:$0xff] }
 0x53e   : > { %v1798_v2 = vadd.f32 %v1795_v33, %v1731_v50  ;;  %v1813_v17 = vmax.f32 %v1797_v47, 0.0 }
 0x53f   : > { %v1816_v10 = vmax.f32 %v1800_v49, 0.0 }
 0x540   : > { %v1814_v57 = vmax.f32 %v1798_v2, 0.0 }
 0x541   : > { %v3676_v0 = vpack.c.bf16 %v1816_v10, %v1815_v3 }
 0x542   : > { %v2719_v9 = vpop.f32.mrb[4].mxu0  ;;  %v1829_v15 = vpack.c.bf16 %v1814_v57, %v1813_v17 }
 0x543   : > { %v1803_v56 = vadd.f32 %v2719_v9, %v1795_v33  ;;  %v1744_v51 = vpop.f32.mrb[5].mxu0 }
 0x544   : > { %v1801_v60 = vadd.f32 %v1795_v33, %v1744_v51  ;;  %v2720_v59 = vpop.f32.mrb[6].mxu0  ;;  %2730 = vmatpush3.bf16.msra.mxu1 %v1829_v15 }
 0x545   : > { %v1804_v63 = vadd.f32 %v2720_v59, %v1795_v33  ;;  %v1747_v58 = vpop.f32.mrb[7].mxu0  ;;  %2731 = vmatprep.subr.bf16.mxu1 %v3168_v28  ;;  %v1819_v5 = vmax.f32 %v1803_v56, 0.0 }
 0x546   : > { %v1802_v4 = vadd.f32 %v1795_v33, %v1747_v58  ;;  %v1817_v62 = vmax.f32 %v1801_v60, 0.0 }
 0x547   : > { %v1820_v6 = vmax.f32 %v1804_v63, 0.0 }
 0x548   : > { %v1818_v61 = vmax.f32 %v1802_v4, 0.0  ;;  %2732 = vmatpush3.bf16.msra.mxu1 %v3676_v0 }
 0x549   : > { %v1832_v1 = vpack.c.bf16 %v1820_v6, %v1819_v5  ;;  %2733 = vmatprep.subr.bf16.mxu1 %v3168_v28 }
 0x54a   : > { %v1831_v7 = vpack.c.bf16 %v1818_v61, %v1817_v62  ;;  %v2723_v8 = vpop.f32.mrb[8].mxu0 }
 0x54b   : > { %v1807_v11 = vadd.f32 %v2723_v8, %v1795_v33  ;;  %v1760_v12 = vpop.f32.mrb[9].mxu0 }
 0x54c   : > { %v1805_v13 = vadd.f32 %v1795_v33, %v1760_v12  ;;  %v2724_v14 = vpop.f32.mrb[10].mxu0  ;;  %2734 = vmatpush3.bf16.msra.mxu1 %v1831_v7 }
 0x54d   : > { %v1808_v16 = vadd.f32 %v2724_v14, %v1795_v33  ;;  %v1763_v18 = vpop.f32.mrb[11].mxu0  ;;  %2735 = vmatprep.subr.bf16.mxu1 %v3168_v28  ;;  %v1823_v53 = vmax.f32 %v1807_v11, 0.0 }
 0x54e   : > { %v1806_v52 = vadd.f32 %v1795_v33, %v1763_v18  ;;  %v1821_v55 = vmax.f32 %v1805_v13, 0.0 }
 0x54f   : > { %v1824_v54 = vmax.f32 %v1808_v16, 0.0 }
 0x550   : > { %v1822_v35 = vmax.f32 %v1806_v52, 0.0  ;;  %2736 = vmatpush3.bf16.msra.mxu1 %v1832_v1 }
 0x551   : > { %v1834_v36 = vpack.c.bf16 %v1824_v54, %v1823_v53  ;;  %2737 = vmatprep.subr.bf16.mxu1 %v3168_v28 }
 0x552   : > { %v1833_v37 = vpack.c.bf16 %v1822_v35, %v1821_v55  ;;  %v2727_v38 = vpop.f32.mrb[12].mxu0 }
 0x553   : > { %v1811_v39 = vadd.f32 %v2727_v38, %v1795_v33  ;;  %v1776_v40 = vpop.f32.mrb[13].mxu0 }
 0x554   : > { %v1809_v41 = vadd.f32 %v1795_v33, %v1776_v40  ;;  %v2728_v42 = vpop.f32.mrb[14].mxu0  ;;  %2738 = vmatpush3.bf16.msra.mxu1 %v1833_v37 }
 0x555   : > { %v1812_v43 = vadd.f32 %v2728_v42, %v1795_v33  ;;  %v1779_v44 = vpop.f32.mrb[15].mxu0  ;;  %2739 = vmatprep.subr.bf16.mxu1 %v3168_v28  ;;  %v1827_v20 = vmax.f32 %v1811_v39, 0.0 }
 0x556   : > { %v1810_v19 = vadd.f32 %v1795_v33, %v1779_v44  ;;  %v1825_v22 = vmax.f32 %v1809_v41, 0.0 }
 0x557   : > { %v1828_v21 = vmax.f32 %v1812_v43, 0.0 }
 0x558   : > { %v1826_v23 = vmax.f32 %v1810_v19, 0.0  ;;  %2740 = vmatpush3.bf16.msra.mxu1 %v1834_v36 }
 0x559   : > { %v1836_v24 = vpack.c.bf16 %v1828_v21, %v1827_v20  ;;  %2741 = vmatprep.subr.bf16.mxu1 %v3168_v28 }
 0x55a   : > { %v1835_v25 = vpack.c.bf16 %v1826_v23, %v1825_v22 }
 0x55c   : > { %2742 = vmatpush3.bf16.msra.mxu1 %v1835_v25 }
 0x55d   : > { %2743 = vmatprep.subr.bf16.mxu1 %v3168_v28 }
 0x560   : > { %2744 = vmatpush3.bf16.msra.mxu1 %v1836_v24 }
 0x561   : > { %2749 = vmatprep.subr.bf16.mxu1 %v3168_v28 }
 0x563   : > { %2746 = vmatmul.mubr.bf16.vlgmr.msra.gmra.mrb[0].mxu1 %v1838_v26 }
 0x564   : > { %2750 = vmatpush3.bf16.msra.mxu1 %v1829_v15  ;;  %2765 = vmatprep.mubr.msk.bf16.mxu1 %vm3169_vm0, %v3168_v28 }
 0x565   : > { %2751 = vmatprep.subr.bf16.mxu1 %v3168_v28 }
 0x568   : > { %2752 = vmatpush3.bf16.msra.mxu1 %v3676_v0 }
 0x569   : > { %2753 = vmatprep.subr.bf16.mxu1 %v3168_v28 }
 0x56c   : > { %2754 = vmatpush3.bf16.msra.mxu1 %v1831_v7 }
 0x56d   : > { %2755 = vmatprep.subr.bf16.mxu1 %v3168_v28 }
 0x570   : > { %2756 = vmatpush3.bf16.msra.mxu1 %v1832_v1 }
 0x571   : > { %2757 = vmatprep.subr.bf16.mxu1 %v3168_v28 }
 0x574   : > { %2758 = vmatpush3.bf16.msra.mxu1 %v1833_v37 }
 0x575   : > { %2759 = vmatprep.subr.bf16.mxu1 %v3168_v28 }
 0x578   : > { %2760 = vmatpush3.bf16.msra.mxu1 %v1834_v36 }
 0x579   : > { %2761 = vmatprep.subr.bf16.mxu1 %v3168_v28 }
 0x57c   : > { %2762 = vmatpush3.bf16.msra.mxu1 %v1835_v25 }
 0x57d   : > { %2763 = vmatprep.subr.bf16.mxu1 %v3168_v28 }
 0x580   : > { %2764 = vmatpush3.bf16.msra.mxu1 %v1836_v24 }
 0x583   : > { %2766 = vmatmul.mubr.bf16.vlgmr.msra.gmra.mrb[4].mxu1 %v1882_v27 }
 0x636   : > { %v1873_v30 = vpop.f32.mrb[0].mxu1 }
 0x637   : > { %v1879_v31 = vadd.f32 %v1873_v30, %v1837_v29  ;;  %v2747_v32 = vpop.f32.mrb[1].mxu1 }
 0x638   : > { %v1876_v33 = vpop.f32.mrb[2].mxu1 }
 0x639   : > { %1880 = vst [vmem:[#allocation5] sm:$0xff] %v1879_v31  ;;  %v2748_v34 = vpop.f32.mrb[3].mxu1 }
 0x656   : > { %v1917_v46 = vpop.f32.mrb[4].mxu1 }
 0x657   : > { %v1923_v47 = vadd.f32 %v1917_v46, %v1881_v45  ;;  %v2767_v48 = vpop.f32.mrb[5].mxu1 }
 0x658   : > { %v1920_v49 = vpop.f32.mrb[6].mxu1 }
 0x659   : > { %1924 = vst [vmem:[#allocation6] sm:$0xff] %v1923_v47  ;;  %v2768_v28 = vpop.f32.mrb[7].mxu1 }
 0x65a PF: > { %1928 = sbr.rel (!%p727_p12) target bundleno = 1977 (0x7b9), region = 100  ;;  %v1930_v50 = vld [vmem:[%s3812_s7] sm:$0xff] (%p727_p12)  ;;  %v3170_v3 = vmov (%p727_p12), 0   ;;  %v3171_v10 = vmov (%p727_p12), 0.0   ;;  %v2978_v57 = vld [vmem:[%s3813_s8 + $0x48] sm:$0xff] (%p727_p12)   ;;  %vm3172_vm1 = vmmov (%p727_p12), 0  }
 0x65b   : > { %v2976_v2 = vld [vmem:[%s3813_s8 + $0x40] sm:$0xff] (%p727_p12)   ;;  %2975 = vset.pattern.permute.xlu0 (%p727_p12), %v3170_v3  ;;  %2769 = vmatprep.subr.bf16.mxu0 (%p727_p12), %v3171_v10  ;;  %v2979_v0 = vld [vmem:[%s3813_s8 + $0x8] sm:$0xff] (%p727_p12)   ;;  %v2980_v9 = vld [vmem:[%s3813_s8 + $0x50] sm:$0xff] (%p727_p12)   ;;  %s3837_s10 = sld [smem:[#allocation23_spill]] (%p727_p12) }
 0x65c   : > { %1933 = vperm.xlu0 (%p727_p12), %2975, %v1930_v50   ;;  %2789 = vmatprep.subr.bf16.mxu1 (%p727_p12), %v3171_v10  ;;  %v2977_v17 = vld [vmem:[%s3813_s8] sm:$0xff] (%p727_p12)   ;;  %v2981_v15 = vld [vmem:[%s3813_s8 + $0x10] sm:$0xff] (%p727_p12)   ;;  %v2982_v56 = vld [vmem:[%s3813_s8 + $0x58] sm:$0xff] (%p727_p12)  }
 0x65d   : > { %2770 = vmatpush3.bf16.msra.mxu0 (%p727_p12), %v2976_v2  ;;  %2790 = vmatpush3.bf16.msra.mxu1 (%p727_p12), %v2977_v17  ;;  %v2983_v51 = vld [vmem:[%s3813_s8 + $0x18] sm:$0xff] (%p727_p12)   ;;  %v2984_v60 = vld [vmem:[%s3813_s8 + $0x60] sm:$0xff] (%p727_p12)   ;;  %v2986_v63 = vld [vmem:[%s3813_s8 + $0x68] sm:$0xff] (%p727_p12)  }
 0x65e   : > { %2771 = vmatprep.subr.bf16.mxu0 (%p727_p12), %v3171_v10  ;;  %2791 = vmatprep.subr.bf16.mxu1 (%p727_p12), %v3171_v10  ;;  %v2985_v59 = vld [vmem:[%s3813_s8 + $0x20] sm:$0xff] (%p727_p12)   ;;  %v2987_v58 = vld [vmem:[%s3813_s8 + $0x28] sm:$0xff] (%p727_p12)   ;;  %v2988_v4 = vld [vmem:[%s3813_s8 + $0x70] sm:$0xff] (%p727_p12)  }
 0x65f   : > { %2785 = vmatprep.mubr.msk.bf16.mxu0 (%p727_p12), %vm3172_vm1, %v3171_v10  ;;  %2805 = vmatprep.mubr.msk.bf16.mxu1 (%p727_p12), %vm3172_vm1, %v3171_v10  ;;  %v2989_v5 = vld [vmem:[%s3813_s8 + $0x30] sm:$0xff] (%p727_p12)   ;;  %v2990_v6 = vld [vmem:[%s3813_s8 + $0x78] sm:$0xff] (%p727_p12)   ;;  %v1929_v1 = vld [vmem:[#allocation5] sm:$0xff] (%p727_p12) }
 0x660   : > { %v2991_v62 = vld [vmem:[%s3813_s8 + $0x38] sm:$0xff] (%p727_p12)   ;;  %v1938_v61 = vld [vmem:[#allocation6] sm:$0xff] (%p727_p12) }
 0x661   : > { %2772 = vmatpush3.bf16.msra.mxu0 %v2978_v57  ;;  %2792 = vmatpush3.bf16.msra.mxu1 %v2979_v0  ;;  %v2396_v18 = vld [vmem:[%s3837_s10] ss:$0 sm:$0xff] }
 0x662   : > { %2773 = vmatprep.subr.bf16.mxu0 %v3171_v10  ;;  %2793 = vmatprep.subr.bf16.mxu1 %v3171_v10 }
 0x665   : > { %2774 = vmatpush3.bf16.msra.mxu0 %v2980_v9  ;;  %2794 = vmatpush3.bf16.msra.mxu1 %v2981_v15 }
 0x666   : > { %2775 = vmatprep.subr.bf16.mxu0 %v3171_v10  ;;  %2795 = vmatprep.subr.bf16.mxu1 %v3171_v10 }
 0x669   : > { %2776 = vmatpush3.bf16.msra.mxu0 %v2982_v56  ;;  %2796 = vmatpush3.bf16.msra.mxu1 %v2983_v51 }
 0x66a   : > { %2777 = vmatprep.subr.bf16.mxu0 %v3171_v10  ;;  %2797 = vmatprep.subr.bf16.mxu1 %v3171_v10 }
 0x66d   : > { %2778 = vmatpush3.bf16.msra.mxu0 %v2984_v60  ;;  %2798 = vmatpush3.bf16.msra.mxu1 %v2985_v59 }
 0x66e   : > { %2779 = vmatprep.subr.bf16.mxu0 %v3171_v10  ;;  %2799 = vmatprep.subr.bf16.mxu1 %v3171_v10 }
 0x671   : > { %2780 = vmatpush3.bf16.msra.mxu0 %v2986_v63  ;;  %2800 = vmatpush3.bf16.msra.mxu1 %v2987_v58 }
 0x672   : > { %2781 = vmatprep.subr.bf16.mxu0 %v3171_v10  ;;  %2801 = vmatprep.subr.bf16.mxu1 %v3171_v10 }
 0x675   : > { %2782 = vmatpush3.bf16.msra.mxu0 %v2988_v4  ;;  %2802 = vmatpush3.bf16.msra.mxu1 %v2989_v5 }
 0x676   : > { %2783 = vmatprep.subr.bf16.mxu0 %v3171_v10  ;;  %2803 = vmatprep.subr.bf16.mxu1 %v3171_v10 }
 0x679   : > { %2784 = vmatpush3.bf16.msra.mxu0 %v2990_v6  ;;  %2804 = vmatpush3.bf16.msra.mxu1 %v2991_v62 }
 0x6db   : > { %v1934_v7 = vpop.permute.xlu0 %1933 }
 0x6dc   : > { %v1936_v8 = vmul.f32 %v1934_v7, %v1929_v1  ;;  %v1939_v11 = vmul.f32 %v1938_v61, %v1934_v7 }
 0x6de   : > { %v1937_v12 = vpack.c.bf16 %v1936_v8, %v1936_v8  ;;  %v1940_v13 = vpack.c.bf16 %v1939_v11, %v1939_v11 }
 0x6e0   : > { %2786 = vmatmul.mubr.bf16.vlgmr.msra.gmra.mrb[0].mxu0 %v1940_v13  ;;  %2806 = vmatmul.mubr.bf16.vlgmr.msra.gmra.mrb[0].mxu1 %v1937_v12 }
 0x7b3   : > { %v2055_v14 = vpop.f32.mrb[0].mxu0  ;;  %v2143_v16 = vpop.f32.mrb[0].mxu1 }
 0x7b4   : > { %v2144_v52 = vadd.f32 %v2143_v16, %v2055_v14  ;;  %v2787_v53 = vpop.f32.mrb[1].mxu0  ;;  %v2807_v54 = vpop.f32.mrb[1].mxu1 }
 0x7b5   : > { %v2058_v55 = vpop.f32.mrb[2].mxu0  ;;  %v2146_v35 = vpop.f32.mrb[2].mxu1 }
 0x7b6   : > { %v2156_v36 = vadd.f32 %v2396_v18, %v2144_v52  ;;  %v2788_v37 = vpop.f32.mrb[3].mxu0  ;;  %v2808_v38 = vpop.f32.mrb[3].mxu1 }
 0x7b8   : > { %2157 = vst [vmem:[#allocation13] sm:$0xff] %v2156_v36 }
 0x7b9 PF: > { %s3838_s21 = sadd.s32 4294967295, %s3158_s18   ;;  %s3173_s23 = smov [#allocation13]  }
 0x7ba   : > { %p3761_p6 = scmp.eq.s32.totalorder %s3838_s21, 1  ;;  %s2165_s12 = sshll.u32 %s3173_s23, 4  ;;  %s2166_s12 = int_to_ptr.vmem [resolvable:$true] %s2165_s12 }
 0x7bb   : > { %s3072_s25 = scalar_lea.vmem %s2166_s12, 128  ;;  %p3079_p5 = scmp.lt.s32.totalorder %s2166_s12, %s2166_s12 }
 0x7bc   : > { %p3073_p7 = scmp.ne.s32.totalorder %s2166_s12, %s3072_s25  ;;  %p3080_p8 = scmp.lt.s32.totalorder %s3072_s25, %s3072_s25 }
 0x7be   : > { %p3074_p1 = pnand %p3073_p7, %p3761_p6  ;;  %p3081_p9 = por %p3080_p8, %p3079_p5 }
 0x7c0   : > { %p3075_p4 = pneg %p3074_p1 }
 0x7c2   : > { %p3082_p10 = pnand %p3081_p9, %p3075_p4 }
 0x7c4   : > { %3085 = shalt.err (!%p3082_p10)
}
 0x7c5   : > { %s3840_s13 = sld [smem:[#allocation24_spill]] }
 0x7cb   : > { %s3841_s22 = smov %s3840_s13  ;;  %s3086_s24 = scalar_lea.hbm %s3840_s13, 128 }
 0x7cc   : > { %p3087_p11 = scmp.ne.s32.totalorder %s3841_s22, %s3086_s24  ;;  %p3092_p3 = scmp.lt.u32.totalorder %s3086_s24, %s3841_s22 }
 0x7ce   : > { %p3088_p13 = pnand %p3087_p11, %p3761_p6 }
 0x7d0   : > { %p3089_p2 = pneg %p3088_p13 }
 0x7d2   : > { %p3094_p12 = pnand %p3092_p3, %p3089_p2 }
 0x7d4   : > { %3097 = shalt.err (!%p3094_p12)
}
 0x7d5   : > { %2880 = dma.vmem_to_hbm [thread:$0]  (%p3761_p6), %s2166_s12, 128, %s3841_s22, [#allocation10]  }
 0x7d6   : > { %3133 = dma.done.wait (%p3761_p6), [#allocation10], 128  }
 0x7d7   : > { %3135 = vsyncadd (%p3761_p6), [#allocation10], 4294967168 }
 0x7d8 PF: > { %s25_s18 = sadd.s32 1, %s3158_s18   ;;  %s3842_s13 = smov %s3142_s14 }
 0x7d9   : > { %p22_p0 = scmp.ge.s32.totalorder %s25_s18, 4   ;;  %s3843_s14 = smov %s3146_s15 }
 0x7da   : > { %s3844_s15 = smov %s3317_s19  ;;  %s3845_s16 = smov %s3154_s17 }
 0x7db   : > { %s3846_s17 = smov %s3848_s26  ;;  %24 = sbr.rel (!%p22_p0) target bundleno = 9 (0x9), region = 152 }
 0x7e2   :  { %2178 = vsyncpa [#allocation9], 1 }
 0x7e3   :  { %2180 = vsyncpa [#allocation9 + $0x1], 1 }
 0x7e4   :  { %2181 = vsyncpa [#allocation12], 1 }
 0x7e5   :  { %2183 = vsyncpa [#allocation12 + $0x1], 1 }
 0x7e6   :  { %2184 = vsyncpa [#allocation10], 1 }
 0x7e7   :  { %2186 = vsyncpa [#allocation10 + $0x1], 1 }
 0x7e8   :  { %2187 = vsyncmov [#allocation7] }
 0x7eb   :  { %s2188_s21 = vpop.sfrf %2187 }
 0x7ec   :  { %p2401_p6 = scmp.ne.s32.totalorder %s2188_s21, 0 }
 0x7ee   :  { %2192 = shalt.err (%p2401_p6)  }

</bundles_post_ra>
